<compile_context>
chip_gen: v6e
topology: v6e:2x2x1
jax: 0.10.0
libtpu: 0.0.40
codegen_flags: <defaults>
</compile_context>

<pallas_src>
import jax
import jax.numpy as jnp
from jax import lax
from jax.experimental import pallas as pl
from jax.experimental.pallas import tpu as pltpu

_LANE = 128
_MAX_ROWS = 64  # 64 rows * 128 lanes = 8192 steps per chunk (well inside VMEM)


def _round_up(x, m):
    return ((x + m - 1) // m) * m


def ifs_scan_kernel(table_ref, idx_ref, px0_ref, py0_ref,
                    x_ref, y_ref, op_ref, px_sc, py_sc):
    """Grid = (batch, step_chunks).  One invocation runs one chunk of steps for
    one batch element, fully vectorized via an affine prefix-composition scan.

    table_ref : (nf+1, 8) f32 in SMEM -> [w00, w01, w10, w11, b0, b1, op, 0];
                row nf is the identity map (used for padded steps).
    idx_ref   : (1, rows, 128) int32  -> function index per step (lane-major).
    px0/py0   : (1, 1, 128) f32       -> initial point, lane-broadcast.
    x/y/op    : (1, rows, 128) f32    -> per-step outputs.
    px_sc/py_sc: (1, 128) f32 VMEM    -> point carried across step chunks.
    """
    f32 = jnp.float32

    @pl.when(pl.program_id(1) == 0)
    def _():
        px_sc[...] = px0_ref[0]
        py_sc[...] = py0_ref[0]

    idx = idx_ref[0]                       # (rows, 128)
    rows = idx.shape[0]
    shape = idx.shape
    n_funcs = table_ref.shape[0]           # nf + 1 (identity row last)

    # ---- Materialize per-step affine params + op from the tiny SMEM table.
    m00 = jnp.zeros(shape, f32)
    m01 = jnp.zeros(shape, f32)
    m10 = jnp.zeros(shape, f32)
    m11 = jnp.zeros(shape, f32)
    c0 = jnp.zeros(shape, f32)
    c1 = jnp.zeros(shape, f32)
    opv = jnp.zeros(shape, f32)
    for f in range(n_funcs):
        sel = idx == f
        m00 = jnp.where(sel, table_ref[f, 0], m00)
        m01 = jnp.where(sel, table_ref[f, 1], m01)
        m10 = jnp.where(sel, table_ref[f, 2], m10)
        m11 = jnp.where(sel, table_ref[f, 3], m11)
        c0 = jnp.where(sel, table_ref[f, 4], c0)
        c1 = jnp.where(sel, table_ref[f, 5], c1)
        opv = jnp.where(sel, table_ref[f, 6], opv)
    op_ref[0] = opv

    # ---- Flat Hillis-Steele inclusive scan over the chunk's step axis under
    # affine-map composition; flat step index s = row * 128 + lane.
    lane = lax.broadcasted_iota(jnp.int32, shape, 1)
    row = lax.broadcasted_iota(jnp.int32, shape, 0)
    total = rows * _LANE

    def shift_down(x, d, fill):
        # out[s] = x[s - d] in flat step order; `fill` (identity) for s < d.
        if d % _LANE == 0:
            k = d // _LANE
            return jnp.where(row >= k, pltpu.roll(x, k, axis=0), fill)
        lr = pltpu.roll(x, d, axis=1)              # same-row part
        if rows == 1:
            return jnp.where(lane >= d, lr, fill)
        pr = pltpu.roll(lr, 1, axis=0)             # wrapped lanes <- previous row
        return jnp.where(lane >= d, lr, jnp.where(row >= 1, pr, fill))

    d = 1
    while d < total:
        s00 = shift_down(m00, d, 1.0)
        s01 = shift_down(m01, d, 0.0)
        s10 = shift_down(m10, d, 0.0)
        s11 = shift_down(m11, d, 1.0)
        sc0 = shift_down(c0, d, 0.0)
        sc1 = shift_down(c1, d, 0.0)
        # current map composed after shifted (earlier) map: cur o shifted
        n00 = m00 * s00 + m01 * s10
        n01 = m00 * s01 + m01 * s11
        n10 = m10 * s00 + m11 * s10
        n11 = m10 * s01 + m11 * s11
        nc0 = m00 * sc0 + m01 * sc1 + c0
        nc1 = m10 * sc0 + m11 * sc1 + c1
        m00, m01, m10, m11, c0, c1 = n00, n01, n10, n11, nc0, nc1
        d *= 2

    # ---- Apply every prefix map to the carried-in point (fully elementwise).
    px = px_sc[...]                       # (1, 128), all lanes equal
    py = py_sc[...]
    x = m00 * px + m01 * py + c0
    y = m10 * px + m11 * py + c1
    x_ref[0] = x
    y_ref[0] = y

    # ---- Carry the chunk's final point to the next step chunk (lane-bcast).
    zeros_row = jnp.zeros((1, _LANE), f32)
    px_sc[...] = x[rows - 1:rows, _LANE - 1:_LANE] + zeros_row
    py_sc[...] = y[rows - 1:rows, _LANE - 1:_LANE] + zeros_row


def parallel_ifs_forward(point, weights, biases, ops, index, remove_points,
                         *, max_rows=_MAX_ROWS):
    """point: (mb,2,1), weights: (nf,2,2), biases: (nf,2,1), ops: (nf,),
    index: (mb, num_points) int. Returns (num_points*mb - remove_points, 3)."""
    f32 = jnp.float32
    mb, num_points = index.shape
    nf = weights.shape[0]

    # ---- Tiny (nf+1, 8) parameter table (SMEM-resident in the kernel).
    # Row nf is the identity affine map, used for padded trailing steps so the
    # carried point stays exact across padding.
    table = jnp.zeros((nf + 1, 8), f32)
    table = table.at[:nf, 0].set(weights[:, 0, 0].astype(f32))
    table = table.at[:nf, 1].set(weights[:, 0, 1].astype(f32))
    table = table.at[:nf, 2].set(weights[:, 1, 0].astype(f32))
    table = table.at[:nf, 3].set(weights[:, 1, 1].astype(f32))
    table = table.at[:nf, 4].set(biases[:, 0, 0].astype(f32))
    table = table.at[:nf, 5].set(biases[:, 1, 0].astype(f32))
    table = table.at[:nf, 6].set(ops.astype(f32))
    table = table.at[nf, 0].set(1.0).at[nf, 3].set(1.0)

    # ---- Steps-in-lanes layout: step s -> (row s // 128, lane s % 128).
    R = pl.cdiv(num_points, _LANE)
    if R <= 1:
        rows, R_pad = 1, 1
    elif R <= max_rows:
        R_pad = _round_up(R, 8)        # keep sublane rolls on multiples of 8
        rows = R_pad
    else:
        rows = max_rows                # multiple of 8
        R_pad = _round_up(R, max_rows)
    npp = R_pad * _LANE
    n_chunks = R_pad // rows

    idx_pad = jnp.pad(index.astype(jnp.int32),
                      ((0, 0), (0, npp - num_points)),
                      constant_values=nf).reshape(mb, R_pad, _LANE)

    px0 = jnp.broadcast_to(point[:, 0, 0].astype(f32).reshape(mb, 1, 1),
                           (mb, 1, _LANE))
    py0 = jnp.broadcast_to(point[:, 1, 0].astype(f32).reshape(mb, 1, 1),
                           (mb, 1, _LANE))

    plane_spec = pl.BlockSpec((1, rows, _LANE), lambda b, c: (b, c, 0))
    p0_spec = pl.BlockSpec((1, 1, _LANE), lambda b, c: (b, 0, 0))
    smem_spec = pl.BlockSpec(memory_space=pltpu.MemorySpace.SMEM)

    x_pl, y_pl, op_pl = pl.pallas_call(
        ifs_scan_kernel,
        out_shape=(jax.ShapeDtypeStruct((mb, R_pad, _LANE), f32),
                   jax.ShapeDtypeStruct((mb, R_pad, _LANE), f32),
                   jax.ShapeDtypeStruct((mb, R_pad, _LANE), f32)),
        grid_spec=pltpu.PrefetchScalarGridSpec(
            num_scalar_prefetch=0,
            grid=(mb, n_chunks),
            in_specs=[smem_spec, plane_spec, p0_spec, p0_spec],
            out_specs=[plane_spec, plane_spec, plane_spec],
            scratch_shapes=[pltpu.VMEM((1, _LANE), f32),
                            pltpu.VMEM((1, _LANE), f32)]),
        compiler_params=pltpu.CompilerParams(
            # step-chunk axis must stay last + "arbitrary" (sequential carry);
            # the batch axis is "parallel" (feeds both v7x TensorCores if mb>=2).
            dimension_semantics=("parallel", "arbitrary")),
    )(table, idx_pad, px0, py0)

    # (mb, R_pad*128) -> (num_points, mb) planes; assemble [x, y, op] rows in
    # step-major-then-batch order, identical to the torch concatenation.
    def trim(a):
        return a.reshape(mb, npp)[:, :num_points].T

    flat = jnp.stack([trim(x_pl), trim(y_pl), trim(op_pl)], axis=-1)
    flat = flat.reshape(num_points * mb, 3)
    return flat[remove_points:, :]


def reference_forward(point, weights, biases, ops, index, remove_points):
    """Pure-JAX port of the PyTorch loop (for correctness check)."""
    mb, num_points = index.shape
    p = point.astype(jnp.float32)
    rows = []
    for i in range(num_points):
        w = weights[index[:, i]]                                 # (mb, 2, 2)
        b = biases[index[:, i]]                                  # (mb, 2, 1)
        op = ops[index[:, i]]                                    # (mb,)
        p = jnp.matmul(w, p) + b                                 # (mb, 2, 1)
        x1 = jnp.concatenate([p, op.reshape(mb, 1, 1)], axis=1)  # (mb, 3, 1)
        rows.append(x1)
    cat = jnp.concatenate(rows, axis=0)[:, :, 0]                 # (np*mb, 3)
    return cat[remove_points:, :]


def sample_functions(code_logits, num_points, model_batches, key):
    # TODO(synk): `sample_functions` is not defined in the source module; use a
    # deterministic categorical sample over the per-batch `code` distribution.
    return jax.random.categorical(
        key, code_logits[:, None, :], axis=-1,
        shape=(model_batches, num_points)).astype(jnp.int32)


if __name__ == "__main__":
    # Small, deterministic setup consistent with the module
    # (randomize_sequence=False path).
    model_batches = 2
    num_points = 32          # ori_num_points
    num_functions = 4
    remove_points = 10 * model_batches

    key = jax.random.PRNGKey(0)
    k_w, k_b, k_op, k_p, k_code, k_samp = jax.random.split(key, 6)

    optimized_weights = 0.5 * jax.random.normal(k_w, (num_functions, 2, 2), jnp.float32)
    optimized_biases = 0.5 * jax.random.normal(k_b, (num_functions, 2, 1), jnp.float32)
    optimized_function_ops = jax.random.normal(k_op, (num_functions,), jnp.float32)
    point = jax.random.normal(k_p, (model_batches, 2, 1), jnp.float32)
    code = jax.random.normal(k_code, (model_batches, num_functions), jnp.float32)

    index = sample_functions(code, num_points, model_batches, k_samp)  # (mb, num_points)

    out = parallel_ifs_forward(point, optimized_weights, optimized_biases,
                               optimized_function_ops, index, remove_points)
    out = jax.block_until_ready(out)

    ref = reference_forward(point, optimized_weights, optimized_biases,
                            optimized_function_ops, index, remove_points)

    assert out.shape == (num_points * model_batches - remove_points, 3), out.shape
    # Tolerance loosened slightly vs. the serial version: the scan re-associates
    # the f32 affine compositions (exact params, different summation order).
    assert jnp.allclose(out, ref, atol=1e-4, rtol=1e-4), (
        f"max abs diff = {jnp.max(jnp.abs(out - ref))}")

    print("KERNEL_OK")
</pallas_src>

<mosaic_0001>
module attributes {stable_mosaic.version = 11 : i64} {
  func.func @ifs_scan_kernel(%arg0: i32, %arg1: i32, %arg2: memref<5x8xf32, #tpu.memory_space<smem>>, %arg3: memref<1x1x128xi32, #tpu.memory_space<vmem>>, %arg4: memref<1x1x128xf32, #tpu.memory_space<vmem>>, %arg5: memref<1x1x128xf32, #tpu.memory_space<vmem>>, %arg6: memref<1x1x128xf32, #tpu.memory_space<vmem>>, %arg7: memref<1x1x128xf32, #tpu.memory_space<vmem>>, %arg8: memref<1x1x128xf32, #tpu.memory_space<vmem>>, %arg9: memref<1x128xf32, #tpu.memory_space<vmem>>, %arg10: memref<1x128xf32, #tpu.memory_space<vmem>>) attributes {dimension_semantics = [#tpu.dimension_semantics<parallel>, #tpu.dimension_semantics<arbitrary>], iteration_bounds = array<i64: 2, 1>, scalar_prefetch = 0 : i64, scratch_operands = 2 : i64, tpu.core_type = #tpu.core_type<tc>, window_params = [{transform_indices = @transform_0, window_bounds = array<i64: 5, 8>}, {transform_indices = @transform_1, window_bounds = array<i64: 1, 1, 128>}, {transform_indices = @transform_2, window_bounds = array<i64: 1, 1, 128>}, {transform_indices = @transform_3, window_bounds = array<i64: 1, 1, 128>}, {transform_indices = @transform_4, window_bounds = array<i64: 1, 1, 128>}, {transform_indices = @transform_5, window_bounds = array<i64: 1, 1, 128>}, {transform_indices = @transform_6, window_bounds = array<i64: 1, 1, 128>}]} {
    %c0_i32 = arith.constant 0 : i32
    %0 = arith.cmpi eq, %arg1, %c0_i32 : i32
    %1 = arith.extui %0 : i1 to i32
    %c0_i32_0 = arith.constant 0 : i32
    %2 = arith.cmpi ne, %1, %c0_i32_0 : i32
    scf.if %2 {
      %c0_214 = arith.constant 0 : index
      %c0_215 = arith.constant 0 : index
      %c0_216 = arith.constant 0 : index
      %506 = vector.load %arg4[%c0_214, %c0_215, %c0_216] : memref<1x1x128xf32, #tpu.memory_space<vmem>>, vector<1x1x128xf32>
      %507 = vector.shape_cast %506 : vector<1x1x128xf32> to vector<1x128xf32>
      %c0_217 = arith.constant 0 : index
      %c0_218 = arith.constant 0 : index
      %508 = vector.load %arg9[%c0_217, %c0_218] : memref<1x128xf32, #tpu.memory_space<vmem>>, vector<1x128xf32>
      tpu.vector_store %arg9[%c0_217, %c0_218], %507 {strides = array<i32>} : memref<1x128xf32, #tpu.memory_space<vmem>>, vector<1x128xf32>,
      %c0_219 = arith.constant 0 : index
      %c0_220 = arith.constant 0 : index
      %c0_221 = arith.constant 0 : index
      %509 = vector.load %arg5[%c0_219, %c0_220, %c0_221] : memref<1x1x128xf32, #tpu.memory_space<vmem>>, vector<1x1x128xf32>
      %510 = vector.shape_cast %509 : vector<1x1x128xf32> to vector<1x128xf32>
      %c0_222 = arith.constant 0 : index
      %c0_223 = arith.constant 0 : index
      %511 = vector.load %arg10[%c0_222, %c0_223] : memref<1x128xf32, #tpu.memory_space<vmem>>, vector<1x128xf32>
      tpu.vector_store %arg10[%c0_222, %c0_223], %510 {strides = array<i32>} : memref<1x128xf32, #tpu.memory_space<vmem>>, vector<1x128xf32>,
    } else {
    }
    %c0 = arith.constant 0 : index
    %c0_1 = arith.constant 0 : index
    %c0_2 = arith.constant 0 : index
    %3 = vector.load %arg3[%c0, %c0_1, %c0_2] : memref<1x1x128xi32, #tpu.memory_space<vmem>>, vector<1x1x128xi32>
    %4 = vector.shape_cast %3 : vector<1x1x128xi32> to vector<1x128xi32>
    %cst = arith.constant 0.000000e+00 : f32
    %5 = vector.broadcast %cst : f32 to vector<1x128xf32>
    %cst_3 = arith.constant 0.000000e+00 : f32
    %6 = vector.broadcast %cst_3 : f32 to vector<1x128xf32>
    %cst_4 = arith.constant 0.000000e+00 : f32
    %7 = vector.broadcast %cst_4 : f32 to vector<1x128xf32>
    %cst_5 = arith.constant 0.000000e+00 : f32
    %8 = vector.broadcast %cst_5 : f32 to vector<1x128xf32>
    %cst_6 = arith.constant 0.000000e+00 : f32
    %9 = vector.broadcast %cst_6 : f32 to vector<1x128xf32>
    %cst_7 = arith.constant 0.000000e+00 : f32
    %10 = vector.broadcast %cst_7 : f32 to vector<1x128xf32>
    %cst_8 = arith.constant 0.000000e+00 : f32
    %11 = vector.broadcast %cst_8 : f32 to vector<1x128xf32>
    %c0_i32_9 = arith.constant 0 : i32
    %12 = vector.broadcast %c0_i32_9 : i32 to vector<1x128xi32>
    %13 = arith.cmpi eq, %4, %12 : vector<1x128xi32>
    %c0_10 = arith.constant 0 : index
    %c0_11 = arith.constant 0 : index
    %14 = memref.load %arg2[%c0_10, %c0_11] : memref<5x8xf32, #tpu.memory_space<smem>>
    %15 = vector.broadcast %14 : f32 to vector<1x128xf32>
    %16 = arith.select %13, %15, %5 : vector<1x128xi1>, vector<1x128xf32>
    %c0_12 = arith.constant 0 : index
    %c1 = arith.constant 1 : index
    %17 = memref.load %arg2[%c0_12, %c1] : memref<5x8xf32, #tpu.memory_space<smem>>
    %18 = vector.broadcast %17 : f32 to vector<1x128xf32>
    %19 = arith.select %13, %18, %6 : vector<1x128xi1>, vector<1x128xf32>
    %c0_13 = arith.constant 0 : index
    %c2 = arith.constant 2 : index
    %20 = memref.load %arg2[%c0_13, %c2] : memref<5x8xf32, #tpu.memory_space<smem>>
    %21 = vector.broadcast %20 : f32 to vector<1x128xf32>
    %22 = arith.select %13, %21, %7 : vector<1x128xi1>, vector<1x128xf32>
    %c0_14 = arith.constant 0 : index
    %c3 = arith.constant 3 : index
    %23 = memref.load %arg2[%c0_14, %c3] : memref<5x8xf32, #tpu.memory_space<smem>>
    %24 = vector.broadcast %23 : f32 to vector<1x128xf32>
    %25 = arith.select %13, %24, %8 : vector<1x128xi1>, vector<1x128xf32>
    %c0_15 = arith.constant 0 : index
    %c4 = arith.constant 4 : index
    %26 = memref.load %arg2[%c0_15, %c4] : memref<5x8xf32, #tpu.memory_space<smem>>
    %27 = vector.broadcast %26 : f32 to vector<1x128xf32>
    %28 = arith.select %13, %27, %9 : vector<1x128xi1>, vector<1x128xf32>
    %c0_16 = arith.constant 0 : index
    %c5 = arith.constant 5 : index
    %29 = memref.load %arg2[%c0_16, %c5] : memref<5x8xf32, #tpu.memory_space<smem>>
    %30 = vector.broadcast %29 : f32 to vector<1x128xf32>
    %31 = arith.select %13, %30, %10 : vector<1x128xi1>, vector<1x128xf32>
    %c0_17 = arith.constant 0 : index
    %c6 = arith.constant 6 : index
    %32 = memref.load %arg2[%c0_17, %c6] : memref<5x8xf32, #tpu.memory_space<smem>>
    %33 = vector.broadcast %32 : f32 to vector<1x128xf32>
    %34 = arith.select %13, %33, %11 : vector<1x128xi1>, vector<1x128xf32>
    %c1_i32 = arith.constant 1 : i32
    %35 = vector.broadcast %c1_i32 : i32 to vector<1x128xi32>
    %36 = arith.cmpi eq, %4, %35 : vector<1x128xi32>
    %c1_18 = arith.constant 1 : index
    %c0_19 = arith.constant 0 : index
    %37 = memref.load %arg2[%c1_18, %c0_19] : memref<5x8xf32, #tpu.memory_space<smem>>
    %38 = vector.broadcast %37 : f32 to vector<1x128xf32>
    %39 = arith.select %36, %38, %16 : vector<1x128xi1>, vector<1x128xf32>
    %c1_20 = arith.constant 1 : index
    %c1_21 = arith.constant 1 : index
    %40 = memref.load %arg2[%c1_20, %c1_21] : memref<5x8xf32, #tpu.memory_space<smem>>
    %41 = vector.broadcast %40 : f32 to vector<1x128xf32>
    %42 = arith.select %36, %41, %19 : vector<1x128xi1>, vector<1x128xf32>
    %c1_22 = arith.constant 1 : index
    %c2_23 = arith.constant 2 : index
    %43 = memref.load %arg2[%c1_22, %c2_23] : memref<5x8xf32, #tpu.memory_space<smem>>
    %44 = vector.broadcast %43 : f32 to vector<1x128xf32>
    %45 = arith.select %36, %44, %22 : vector<1x128xi1>, vector<1x128xf32>
    %c1_24 = arith.constant 1 : index
    %c3_25 = arith.constant 3 : index
    %46 = memref.load %arg2[%c1_24, %c3_25] : memref<5x8xf32, #tpu.memory_space<smem>>
    %47 = vector.broadcast %46 : f32 to vector<1x128xf32>
    %48 = arith.select %36, %47, %25 : vector<1x128xi1>, vector<1x128xf32>
    %c1_26 = arith.constant 1 : index
    %c4_27 = arith.constant 4 : index
    %49 = memref.load %arg2[%c1_26, %c4_27] : memref<5x8xf32, #tpu.memory_space<smem>>
    %50 = vector.broadcast %49 : f32 to vector<1x128xf32>
    %51 = arith.select %36, %50, %28 : vector<1x128xi1>, vector<1x128xf32>
    %c1_28 = arith.constant 1 : index
    %c5_29 = arith.constant 5 : index
    %52 = memref.load %arg2[%c1_28, %c5_29] : memref<5x8xf32, #tpu.memory_space<smem>>
    %53 = vector.broadcast %52 : f32 to vector<1x128xf32>
    %54 = arith.select %36, %53, %31 : vector<1x128xi1>, vector<1x128xf32>
    %c1_30 = arith.constant 1 : index
    %c6_31 = arith.constant 6 : index
    %55 = memref.load %arg2[%c1_30, %c6_31] : memref<5x8xf32, #tpu.memory_space<smem>>
    %56 = vector.broadcast %55 : f32 to vector<1x128xf32>
    %57 = arith.select %36, %56, %34 : vector<1x128xi1>, vector<1x128xf32>
    %c2_i32 = arith.constant 2 : i32
    %58 = vector.broadcast %c2_i32 : i32 to vector<1x128xi32>
    %59 = arith.cmpi eq, %4, %58 : vector<1x128xi32>
    %c2_32 = arith.constant 2 : index
    %c0_33 = arith.constant 0 : index
    %60 = memref.load %arg2[%c2_32, %c0_33] : memref<5x8xf32, #tpu.memory_space<smem>>
    %61 = vector.broadcast %60 : f32 to vector<1x128xf32>
    %62 = arith.select %59, %61, %39 : vector<1x128xi1>, vector<1x128xf32>
    %c2_34 = arith.constant 2 : index
    %c1_35 = arith.constant 1 : index
    %63 = memref.load %arg2[%c2_34, %c1_35] : memref<5x8xf32, #tpu.memory_space<smem>>
    %64 = vector.broadcast %63 : f32 to vector<1x128xf32>
    %65 = arith.select %59, %64, %42 : vector<1x128xi1>, vector<1x128xf32>
    %c2_36 = arith.constant 2 : index
    %c2_37 = arith.constant 2 : index
    %66 = memref.load %arg2[%c2_36, %c2_37] : memref<5x8xf32, #tpu.memory_space<smem>>
    %67 = vector.broadcast %66 : f32 to vector<1x128xf32>
    %68 = arith.select %59, %67, %45 : vector<1x128xi1>, vector<1x128xf32>
    %c2_38 = arith.constant 2 : index
    %c3_39 = arith.constant 3 : index
    %69 = memref.load %arg2[%c2_38, %c3_39] : memref<5x8xf32, #tpu.memory_space<smem>>
    %70 = vector.broadcast %69 : f32 to vector<1x128xf32>
    %71 = arith.select %59, %70, %48 : vector<1x128xi1>, vector<1x128xf32>
    %c2_40 = arith.constant 2 : index
    %c4_41 = arith.constant 4 : index
    %72 = memref.load %arg2[%c2_40, %c4_41] : memref<5x8xf32, #tpu.memory_space<smem>>
    %73 = vector.broadcast %72 : f32 to vector<1x128xf32>
    %74 = arith.select %59, %73, %51 : vector<1x128xi1>, vector<1x128xf32>
    %c2_42 = arith.constant 2 : index
    %c5_43 = arith.constant 5 : index
    %75 = memref.load %arg2[%c2_42, %c5_43] : memref<5x8xf32, #tpu.memory_space<smem>>
    %76 = vector.broadcast %75 : f32 to vector<1x128xf32>
    %77 = arith.select %59, %76, %54 : vector<1x128xi1>, vector<1x128xf32>
    %c2_44 = arith.constant 2 : index
    %c6_45 = arith.constant 6 : index
    %78 = memref.load %arg2[%c2_44, %c6_45] : memref<5x8xf32, #tpu.memory_space<smem>>
    %79 = vector.broadcast %78 : f32 to vector<1x128xf32>
    %80 = arith.select %59, %79, %57 : vector<1x128xi1>, vector<1x128xf32>
    %c3_i32 = arith.constant 3 : i32
    %81 = vector.broadcast %c3_i32 : i32 to vector<1x128xi32>
    %82 = arith.cmpi eq, %4, %81 : vector<1x128xi32>
    %c3_46 = arith.constant 3 : index
    %c0_47 = arith.constant 0 : index
    %83 = memref.load %arg2[%c3_46, %c0_47] : memref<5x8xf32, #tpu.memory_space<smem>>
    %84 = vector.broadcast %83 : f32 to vector<1x128xf32>
    %85 = arith.select %82, %84, %62 : vector<1x128xi1>, vector<1x128xf32>
    %c3_48 = arith.constant 3 : index
    %c1_49 = arith.constant 1 : index
    %86 = memref.load %arg2[%c3_48, %c1_49] : memref<5x8xf32, #tpu.memory_space<smem>>
    %87 = vector.broadcast %86 : f32 to vector<1x128xf32>
    %88 = arith.select %82, %87, %65 : vector<1x128xi1>, vector<1x128xf32>
    %c3_50 = arith.constant 3 : index
    %c2_51 = arith.constant 2 : index
    %89 = memref.load %arg2[%c3_50, %c2_51] : memref<5x8xf32, #tpu.memory_space<smem>>
    %90 = vector.broadcast %89 : f32 to vector<1x128xf32>
    %91 = arith.select %82, %90, %68 : vector<1x128xi1>, vector<1x128xf32>
    %c3_52 = arith.constant 3 : index
    %c3_53 = arith.constant 3 : index
    %92 = memref.load %arg2[%c3_52, %c3_53] : memref<5x8xf32, #tpu.memory_space<smem>>
    %93 = vector.broadcast %92 : f32 to vector<1x128xf32>
    %94 = arith.select %82, %93, %71 : vector<1x128xi1>, vector<1x128xf32>
    %c3_54 = arith.constant 3 : index
    %c4_55 = arith.constant 4 : index
    %95 = memref.load %arg2[%c3_54, %c4_55] : memref<5x8xf32, #tpu.memory_space<smem>>
    %96 = vector.broadcast %95 : f32 to vector<1x128xf32>
    %97 = arith.select %82, %96, %74 : vector<1x128xi1>, vector<1x128xf32>
    %c3_56 = arith.constant 3 : index
    %c5_57 = arith.constant 5 : index
    %98 = memref.load %arg2[%c3_56, %c5_57] : memref<5x8xf32, #tpu.memory_space<smem>>
    %99 = vector.broadcast %98 : f32 to vector<1x128xf32>
    %100 = arith.select %82, %99, %77 : vector<1x128xi1>, vector<1x128xf32>
    %c3_58 = arith.constant 3 : index
    %c6_59 = arith.constant 6 : index
    %101 = memref.load %arg2[%c3_58, %c6_59] : memref<5x8xf32, #tpu.memory_space<smem>>
    %102 = vector.broadcast %101 : f32 to vector<1x128xf32>
    %103 = arith.select %82, %102, %80 : vector<1x128xi1>, vector<1x128xf32>
    %c4_i32 = arith.constant 4 : i32
    %104 = vector.broadcast %c4_i32 : i32 to vector<1x128xi32>
    %105 = arith.cmpi eq, %4, %104 : vector<1x128xi32>
    %c4_60 = arith.constant 4 : index
    %c0_61 = arith.constant 0 : index
    %106 = memref.load %arg2[%c4_60, %c0_61] : memref<5x8xf32, #tpu.memory_space<smem>>
    %107 = vector.broadcast %106 : f32 to vector<1x128xf32>
    %108 = arith.select %105, %107, %85 : vector<1x128xi1>, vector<1x128xf32>
    %c4_62 = arith.constant 4 : index
    %c1_63 = arith.constant 1 : index
    %109 = memref.load %arg2[%c4_62, %c1_63] : memref<5x8xf32, #tpu.memory_space<smem>>
    %110 = vector.broadcast %109 : f32 to vector<1x128xf32>
    %111 = arith.select %105, %110, %88 : vector<1x128xi1>, vector<1x128xf32>
    %c4_64 = arith.constant 4 : index
    %c2_65 = arith.constant 2 : index
    %112 = memref.load %arg2[%c4_64, %c2_65] : memref<5x8xf32, #tpu.memory_space<smem>>
    %113 = vector.broadcast %112 : f32 to vector<1x128xf32>
    %114 = arith.select %105, %113, %91 : vector<1x128xi1>, vector<1x128xf32>
    %c4_66 = arith.constant 4 : index
    %c3_67 = arith.constant 3 : index
    %115 = memref.load %arg2[%c4_66, %c3_67] : memref<5x8xf32, #tpu.memory_space<smem>>
    %116 = vector.broadcast %115 : f32 to vector<1x128xf32>
    %117 = arith.select %105, %116, %94 : vector<1x128xi1>, vector<1x128xf32>
    %c4_68 = arith.constant 4 : index
    %c4_69 = arith.constant 4 : index
    %118 = memref.load %arg2[%c4_68, %c4_69] : memref<5x8xf32, #tpu.memory_space<smem>>
    %119 = vector.broadcast %118 : f32 to vector<1x128xf32>
    %120 = arith.select %105, %119, %97 : vector<1x128xi1>, vector<1x128xf32>
    %c4_70 = arith.constant 4 : index
    %c5_71 = arith.constant 5 : index
    %121 = memref.load %arg2[%c4_70, %c5_71] : memref<5x8xf32, #tpu.memory_space<smem>>
    %122 = vector.broadcast %121 : f32 to vector<1x128xf32>
    %123 = arith.select %105, %122, %100 : vector<1x128xi1>, vector<1x128xf32>
    %c4_72 = arith.constant 4 : index
    %c6_73 = arith.constant 6 : index
    %124 = memref.load %arg2[%c4_72, %c6_73] : memref<5x8xf32, #tpu.memory_space<smem>>
    %125 = vector.broadcast %124 : f32 to vector<1x128xf32>
    %126 = arith.select %105, %125, %103 : vector<1x128xi1>, vector<1x128xf32>
    %c0_74 = arith.constant 0 : index
    %c0_75 = arith.constant 0 : index
    %c0_76 = arith.constant 0 : index
    %127 = vector.load %arg8[%c0_74, %c0_75, %c0_76] : memref<1x1x128xf32, #tpu.memory_space<vmem>>, vector<1x1x128xf32>
    %128 = vector.shape_cast %127 : vector<1x1x128xf32> to vector<1x128xf32>
    %129 = vector.shape_cast %126 : vector<1x128xf32> to vector<1x1x128xf32>
    tpu.vector_store %arg8[%c0_74, %c0_75, %c0_76], %129 {strides = array<i32>} : memref<1x1x128xf32, #tpu.memory_space<vmem>>, vector<1x1x128xf32>,
    %130 = tpu.iota {dimensions = array<i32: 1>} : vector<1x128xi32>
    %c1_i32_77 = arith.constant 1 : i32
    %131 = tpu.dynamic_rotate %108 by %c1_i32_77 dim 1 : vector<1x128xf32>, i32 -> vector<1x128xf32>
    %c1_i32_78 = arith.constant 1 : i32
    %132 = vector.broadcast %c1_i32_78 : i32 to vector<1x128xi32>
    %133 = arith.cmpi sge, %130, %132 : vector<1x128xi32>
    %cst_79 = arith.constant 1.000000e+00 : f32
    %134 = vector.broadcast %cst_79 : f32 to vector<1x128xf32>
    %135 = arith.select %133, %131, %134 : vector<1x128xi1>, vector<1x128xf32>
    %c1_i32_80 = arith.constant 1 : i32
    %136 = tpu.dynamic_rotate %111 by %c1_i32_80 dim 1 : vector<1x128xf32>, i32 -> vector<1x128xf32>
    %c1_i32_81 = arith.constant 1 : i32
    %137 = vector.broadcast %c1_i32_81 : i32 to vector<1x128xi32>
    %138 = arith.cmpi sge, %130, %137 : vector<1x128xi32>
    %cst_82 = arith.constant 0.000000e+00 : f32
    %139 = vector.broadcast %cst_82 : f32 to vector<1x128xf32>
    %140 = arith.select %138, %136, %139 : vector<1x128xi1>, vector<1x128xf32>
    %c1_i32_83 = arith.constant 1 : i32
    %141 = tpu.dynamic_rotate %114 by %c1_i32_83 dim 1 : vector<1x128xf32>, i32 -> vector<1x128xf32>
    %c1_i32_84 = arith.constant 1 : i32
    %142 = vector.broadcast %c1_i32_84 : i32 to vector<1x128xi32>
    %143 = arith.cmpi sge, %130, %142 : vector<1x128xi32>
    %cst_85 = arith.constant 0.000000e+00 : f32
    %144 = vector.broadcast %cst_85 : f32 to vector<1x128xf32>
    %145 = arith.select %143, %141, %144 : vector<1x128xi1>, vector<1x128xf32>
    %c1_i32_86 = arith.constant 1 : i32
    %146 = tpu.dynamic_rotate %117 by %c1_i32_86 dim 1 : vector<1x128xf32>, i32 -> vector<1x128xf32>
    %c1_i32_87 = arith.constant 1 : i32
    %147 = vector.broadcast %c1_i32_87 : i32 to vector<1x128xi32>
    %148 = arith.cmpi sge, %130, %147 : vector<1x128xi32>
    %cst_88 = arith.constant 1.000000e+00 : f32
    %149 = vector.broadcast %cst_88 : f32 to vector<1x128xf32>
    %150 = arith.select %148, %146, %149 : vector<1x128xi1>, vector<1x128xf32>
    %c1_i32_89 = arith.constant 1 : i32
    %151 = tpu.dynamic_rotate %120 by %c1_i32_89 dim 1 : vector<1x128xf32>, i32 -> vector<1x128xf32>
    %c1_i32_90 = arith.constant 1 : i32
    %152 = vector.broadcast %c1_i32_90 : i32 to vector<1x128xi32>
    %153 = arith.cmpi sge, %130, %152 : vector<1x128xi32>
    %cst_91 = arith.constant 0.000000e+00 : f32
    %154 = vector.broadcast %cst_91 : f32 to vector<1x128xf32>
    %155 = arith.select %153, %151, %154 : vector<1x128xi1>, vector<1x128xf32>
    %c1_i32_92 = arith.constant 1 : i32
    %156 = tpu.dynamic_rotate %123 by %c1_i32_92 dim 1 : vector<1x128xf32>, i32 -> vector<1x128xf32>
    %c1_i32_93 = arith.constant 1 : i32
    %157 = vector.broadcast %c1_i32_93 : i32 to vector<1x128xi32>
    %158 = arith.cmpi sge, %130, %157 : vector<1x128xi32>
    %cst_94 = arith.constant 0.000000e+00 : f32
    %159 = vector.broadcast %cst_94 : f32 to vector<1x128xf32>
    %160 = arith.select %158, %156, %159 : vector<1x128xi1>, vector<1x128xf32>
    %161 = arith.mulf %108, %135 : vector<1x128xf32>
    %162 = arith.mulf %111, %145 : vector<1x128xf32>
    %163 = arith.addf %161, %162 : vector<1x128xf32>
    %164 = arith.mulf %108, %140 : vector<1x128xf32>
    %165 = arith.mulf %111, %150 : vector<1x128xf32>
    %166 = arith.addf %164, %165 : vector<1x128xf32>
    %167 = arith.mulf %114, %135 : vector<1x128xf32>
    %168 = arith.mulf %117, %145 : vector<1x128xf32>
    %169 = arith.addf %167, %168 : vector<1x128xf32>
    %170 = arith.mulf %114, %140 : vector<1x128xf32>
    %171 = arith.mulf %117, %150 : vector<1x128xf32>
    %172 = arith.addf %170, %171 : vector<1x128xf32>
    %173 = arith.mulf %108, %155 : vector<1x128xf32>
    %174 = arith.mulf %111, %160 : vector<1x128xf32>
    %175 = arith.addf %173, %174 : vector<1x128xf32>
    %176 = arith.addf %175, %120 : vector<1x128xf32>
    %177 = arith.mulf %114, %155 : vector<1x128xf32>
    %178 = arith.mulf %117, %160 : vector<1x128xf32>
    %179 = arith.addf %177, %178 : vector<1x128xf32>
    %180 = arith.addf %179, %123 : vector<1x128xf32>
    %c2_i32_95 = arith.constant 2 : i32
    %181 = tpu.dynamic_rotate %163 by %c2_i32_95 dim 1 : vector<1x128xf32>, i32 -> vector<1x128xf32>
    %c2_i32_96 = arith.constant 2 : i32
    %182 = vector.broadcast %c2_i32_96 : i32 to vector<1x128xi32>
    %183 = arith.cmpi sge, %130, %182 : vector<1x128xi32>
    %cst_97 = arith.constant 1.000000e+00 : f32
    %184 = vector.broadcast %cst_97 : f32 to vector<1x128xf32>
    %185 = arith.select %183, %181, %184 : vector<1x128xi1>, vector<1x128xf32>
    %c2_i32_98 = arith.constant 2 : i32
    %186 = tpu.dynamic_rotate %166 by %c2_i32_98 dim 1 : vector<1x128xf32>, i32 -> vector<1x128xf32>
    %c2_i32_99 = arith.constant 2 : i32
    %187 = vector.broadcast %c2_i32_99 : i32 to vector<1x128xi32>
    %188 = arith.cmpi sge, %130, %187 : vector<1x128xi32>
    %cst_100 = arith.constant 0.000000e+00 : f32
    %189 = vector.broadcast %cst_100 : f32 to vector<1x128xf32>
    %190 = arith.select %188, %186, %189 : vector<1x128xi1>, vector<1x128xf32>
    %c2_i32_101 = arith.constant 2 : i32
    %191 = tpu.dynamic_rotate %169 by %c2_i32_101 dim 1 : vector<1x128xf32>, i32 -> vector<1x128xf32>
    %c2_i32_102 = arith.constant 2 : i32
    %192 = vector.broadcast %c2_i32_102 : i32 to vector<1x128xi32>
    %193 = arith.cmpi sge, %130, %192 : vector<1x128xi32>
    %cst_103 = arith.constant 0.000000e+00 : f32
    %194 = vector.broadcast %cst_103 : f32 to vector<1x128xf32>
    %195 = arith.select %193, %191, %194 : vector<1x128xi1>, vector<1x128xf32>
    %c2_i32_104 = arith.constant 2 : i32
    %196 = tpu.dynamic_rotate %172 by %c2_i32_104 dim 1 : vector<1x128xf32>, i32 -> vector<1x128xf32>
    %c2_i32_105 = arith.constant 2 : i32
    %197 = vector.broadcast %c2_i32_105 : i32 to vector<1x128xi32>
    %198 = arith.cmpi sge, %130, %197 : vector<1x128xi32>
    %cst_106 = arith.constant 1.000000e+00 : f32
    %199 = vector.broadcast %cst_106 : f32 to vector<1x128xf32>
    %200 = arith.select %198, %196, %199 : vector<1x128xi1>, vector<1x128xf32>
    %c2_i32_107 = arith.constant 2 : i32
    %201 = tpu.dynamic_rotate %176 by %c2_i32_107 dim 1 : vector<1x128xf32>, i32 -> vector<1x128xf32>
    %c2_i32_108 = arith.constant 2 : i32
    %202 = vector.broadcast %c2_i32_108 : i32 to vector<1x128xi32>
    %203 = arith.cmpi sge, %130, %202 : vector<1x128xi32>
    %cst_109 = arith.constant 0.000000e+00 : f32
    %204 = vector.broadcast %cst_109 : f32 to vector<1x128xf32>
    %205 = arith.select %203, %201, %204 : vector<1x128xi1>, vector<1x128xf32>
    %c2_i32_110 = arith.constant 2 : i32
    %206 = tpu.dynamic_rotate %180 by %c2_i32_110 dim 1 : vector<1x128xf32>, i32 -> vector<1x128xf32>
    %c2_i32_111 = arith.constant 2 : i32
    %207 = vector.broadcast %c2_i32_111 : i32 to vector<1x128xi32>
    %208 = arith.cmpi sge, %130, %207 : vector<1x128xi32>
    %cst_112 = arith.constant 0.000000e+00 : f32
    %209 = vector.broadcast %cst_112 : f32 to vector<1x128xf32>
    %210 = arith.select %208, %206, %209 : vector<1x128xi1>, vector<1x128xf32>
    %211 = arith.mulf %163, %185 : vector<1x128xf32>
    %212 = arith.mulf %166, %195 : vector<1x128xf32>
    %213 = arith.addf %211, %212 : vector<1x128xf32>
    %214 = arith.mulf %163, %190 : vector<1x128xf32>
    %215 = arith.mulf %166, %200 : vector<1x128xf32>
    %216 = arith.addf %214, %215 : vector<1x128xf32>
    %217 = arith.mulf %169, %185 : vector<1x128xf32>
    %218 = arith.mulf %172, %195 : vector<1x128xf32>
    %219 = arith.addf %217, %218 : vector<1x128xf32>
    %220 = arith.mulf %169, %190 : vector<1x128xf32>
    %221 = arith.mulf %172, %200 : vector<1x128xf32>
    %222 = arith.addf %220, %221 : vector<1x128xf32>
    %223 = arith.mulf %163, %205 : vector<1x128xf32>
    %224 = arith.mulf %166, %210 : vector<1x128xf32>
    %225 = arith.addf %223, %224 : vector<1x128xf32>
    %226 = arith.addf %225, %176 : vector<1x128xf32>
    %227 = arith.mulf %169, %205 : vector<1x128xf32>
    %228 = arith.mulf %172, %210 : vector<1x128xf32>
    %229 = arith.addf %227, %228 : vector<1x128xf32>
    %230 = arith.addf %229, %180 : vector<1x128xf32>
    %c4_i32_113 = arith.constant 4 : i32
    %231 = tpu.dynamic_rotate %213 by %c4_i32_113 dim 1 : vector<1x128xf32>, i32 -> vector<1x128xf32>
    %c4_i32_114 = arith.constant 4 : i32
    %232 = vector.broadcast %c4_i32_114 : i32 to vector<1x128xi32>
    %233 = arith.cmpi sge, %130, %232 : vector<1x128xi32>
    %cst_115 = arith.constant 1.000000e+00 : f32
    %234 = vector.broadcast %cst_115 : f32 to vector<1x128xf32>
    %235 = arith.select %233, %231, %234 : vector<1x128xi1>, vector<1x128xf32>
    %c4_i32_116 = arith.constant 4 : i32
    %236 = tpu.dynamic_rotate %216 by %c4_i32_116 dim 1 : vector<1x128xf32>, i32 -> vector<1x128xf32>
    %c4_i32_117 = arith.constant 4 : i32
    %237 = vector.broadcast %c4_i32_117 : i32 to vector<1x128xi32>
    %238 = arith.cmpi sge, %130, %237 : vector<1x128xi32>
    %cst_118 = arith.constant 0.000000e+00 : f32
    %239 = vector.broadcast %cst_118 : f32 to vector<1x128xf32>
    %240 = arith.select %238, %236, %239 : vector<1x128xi1>, vector<1x128xf32>
    %c4_i32_119 = arith.constant 4 : i32
    %241 = tpu.dynamic_rotate %219 by %c4_i32_119 dim 1 : vector<1x128xf32>, i32 -> vector<1x128xf32>
    %c4_i32_120 = arith.constant 4 : i32
    %242 = vector.broadcast %c4_i32_120 : i32 to vector<1x128xi32>
    %243 = arith.cmpi sge, %130, %242 : vector<1x128xi32>
    %cst_121 = arith.constant 0.000000e+00 : f32
    %244 = vector.broadcast %cst_121 : f32 to vector<1x128xf32>
    %245 = arith.select %243, %241, %244 : vector<1x128xi1>, vector<1x128xf32>
    %c4_i32_122 = arith.constant 4 : i32
    %246 = tpu.dynamic_rotate %222 by %c4_i32_122 dim 1 : vector<1x128xf32>, i32 -> vector<1x128xf32>
    %c4_i32_123 = arith.constant 4 : i32
    %247 = vector.broadcast %c4_i32_123 : i32 to vector<1x128xi32>
    %248 = arith.cmpi sge, %130, %247 : vector<1x128xi32>
    %cst_124 = arith.constant 1.000000e+00 : f32
    %249 = vector.broadcast %cst_124 : f32 to vector<1x128xf32>
    %250 = arith.select %248, %246, %249 : vector<1x128xi1>, vector<1x128xf32>
    %c4_i32_125 = arith.constant 4 : i32
    %251 = tpu.dynamic_rotate %226 by %c4_i32_125 dim 1 : vector<1x128xf32>, i32 -> vector<1x128xf32>
    %c4_i32_126 = arith.constant 4 : i32
    %252 = vector.broadcast %c4_i32_126 : i32 to vector<1x128xi32>
    %253 = arith.cmpi sge, %130, %252 : vector<1x128xi32>
    %cst_127 = arith.constant 0.000000e+00 : f32
    %254 = vector.broadcast %cst_127 : f32 to vector<1x128xf32>
    %255 = arith.select %253, %251, %254 : vector<1x128xi1>, vector<1x128xf32>
    %c4_i32_128 = arith.constant 4 : i32
    %256 = tpu.dynamic_rotate %230 by %c4_i32_128 dim 1 : vector<1x128xf32>, i32 -> vector<1x128xf32>
    %c4_i32_129 = arith.constant 4 : i32
    %257 = vector.broadcast %c4_i32_129 : i32 to vector<1x128xi32>
    %258 = arith.cmpi sge, %130, %257 : vector<1x128xi32>
    %cst_130 = arith.constant 0.000000e+00 : f32
    %259 = vector.broadcast %cst_130 : f32 to vector<1x128xf32>
    %260 = arith.select %258, %256, %259 : vector<1x128xi1>, vector<1x128xf32>
    %261 = arith.mulf %213, %235 : vector<1x128xf32>
    %262 = arith.mulf %216, %245 : vector<1x128xf32>
    %263 = arith.addf %261, %262 : vector<1x128xf32>
    %264 = arith.mulf %213, %240 : vector<1x128xf32>
    %265 = arith.mulf %216, %250 : vector<1x128xf32>
    %266 = arith.addf %264, %265 : vector<1x128xf32>
    %267 = arith.mulf %219, %235 : vector<1x128xf32>
    %268 = arith.mulf %222, %245 : vector<1x128xf32>
    %269 = arith.addf %267, %268 : vector<1x128xf32>
    %270 = arith.mulf %219, %240 : vector<1x128xf32>
    %271 = arith.mulf %222, %250 : vector<1x128xf32>
    %272 = arith.addf %270, %271 : vector<1x128xf32>
    %273 = arith.mulf %213, %255 : vector<1x128xf32>
    %274 = arith.mulf %216, %260 : vector<1x128xf32>
    %275 = arith.addf %273, %274 : vector<1x128xf32>
    %276 = arith.addf %275, %226 : vector<1x128xf32>
    %277 = arith.mulf %219, %255 : vector<1x128xf32>
    %278 = arith.mulf %222, %260 : vector<1x128xf32>
    %279 = arith.addf %277, %278 : vector<1x128xf32>
    %280 = arith.addf %279, %230 : vector<1x128xf32>
    %c8_i32 = arith.constant 8 : i32
    %281 = tpu.dynamic_rotate %263 by %c8_i32 dim 1 : vector<1x128xf32>, i32 -> vector<1x128xf32>
    %c8_i32_131 = arith.constant 8 : i32
    %282 = vector.broadcast %c8_i32_131 : i32 to vector<1x128xi32>
    %283 = arith.cmpi sge, %130, %282 : vector<1x128xi32>
    %cst_132 = arith.constant 1.000000e+00 : f32
    %284 = vector.broadcast %cst_132 : f32 to vector<1x128xf32>
    %285 = arith.select %283, %281, %284 : vector<1x128xi1>, vector<1x128xf32>
    %c8_i32_133 = arith.constant 8 : i32
    %286 = tpu.dynamic_rotate %266 by %c8_i32_133 dim 1 : vector<1x128xf32>, i32 -> vector<1x128xf32>
    %c8_i32_134 = arith.constant 8 : i32
    %287 = vector.broadcast %c8_i32_134 : i32 to vector<1x128xi32>
    %288 = arith.cmpi sge, %130, %287 : vector<1x128xi32>
    %cst_135 = arith.constant 0.000000e+00 : f32
    %289 = vector.broadcast %cst_135 : f32 to vector<1x128xf32>
    %290 = arith.select %288, %286, %289 : vector<1x128xi1>, vector<1x128xf32>
    %c8_i32_136 = arith.constant 8 : i32
    %291 = tpu.dynamic_rotate %269 by %c8_i32_136 dim 1 : vector<1x128xf32>, i32 -> vector<1x128xf32>
    %c8_i32_137 = arith.constant 8 : i32
    %292 = vector.broadcast %c8_i32_137 : i32 to vector<1x128xi32>
    %293 = arith.cmpi sge, %130, %292 : vector<1x128xi32>
    %cst_138 = arith.constant 0.000000e+00 : f32
    %294 = vector.broadcast %cst_138 : f32 to vector<1x128xf32>
    %295 = arith.select %293, %291, %294 : vector<1x128xi1>, vector<1x128xf32>
    %c8_i32_139 = arith.constant 8 : i32
    %296 = tpu.dynamic_rotate %272 by %c8_i32_139 dim 1 : vector<1x128xf32>, i32 -> vector<1x128xf32>
    %c8_i32_140 = arith.constant 8 : i32
    %297 = vector.broadcast %c8_i32_140 : i32 to vector<1x128xi32>
    %298 = arith.cmpi sge, %130, %297 : vector<1x128xi32>
    %cst_141 = arith.constant 1.000000e+00 : f32
    %299 = vector.broadcast %cst_141 : f32 to vector<1x128xf32>
    %300 = arith.select %298, %296, %299 : vector<1x128xi1>, vector<1x128xf32>
    %c8_i32_142 = arith.constant 8 : i32
    %301 = tpu.dynamic_rotate %276 by %c8_i32_142 dim 1 : vector<1x128xf32>, i32 -> vector<1x128xf32>
    %c8_i32_143 = arith.constant 8 : i32
    %302 = vector.broadcast %c8_i32_143 : i32 to vector<1x128xi32>
    %303 = arith.cmpi sge, %130, %302 : vector<1x128xi32>
    %cst_144 = arith.constant 0.000000e+00 : f32
    %304 = vector.broadcast %cst_144 : f32 to vector<1x128xf32>
    %305 = arith.select %303, %301, %304 : vector<1x128xi1>, vector<1x128xf32>
    %c8_i32_145 = arith.constant 8 : i32
    %306 = tpu.dynamic_rotate %280 by %c8_i32_145 dim 1 : vector<1x128xf32>, i32 -> vector<1x128xf32>
    %c8_i32_146 = arith.constant 8 : i32
    %307 = vector.broadcast %c8_i32_146 : i32 to vector<1x128xi32>
    %308 = arith.cmpi sge, %130, %307 : vector<1x128xi32>
    %cst_147 = arith.constant 0.000000e+00 : f32
    %309 = vector.broadcast %cst_147 : f32 to vector<1x128xf32>
    %310 = arith.select %308, %306, %309 : vector<1x128xi1>, vector<1x128xf32>
    %311 = arith.mulf %263, %285 : vector<1x128xf32>
    %312 = arith.mulf %266, %295 : vector<1x128xf32>
    %313 = arith.addf %311, %312 : vector<1x128xf32>
    %314 = arith.mulf %263, %290 : vector<1x128xf32>
    %315 = arith.mulf %266, %300 : vector<1x128xf32>
    %316 = arith.addf %314, %315 : vector<1x128xf32>
    %317 = arith.mulf %269, %285 : vector<1x128xf32>
    %318 = arith.mulf %272, %295 : vector<1x128xf32>
    %319 = arith.addf %317, %318 : vector<1x128xf32>
    %320 = arith.mulf %269, %290 : vector<1x128xf32>
    %321 = arith.mulf %272, %300 : vector<1x128xf32>
    %322 = arith.addf %320, %321 : vector<1x128xf32>
    %323 = arith.mulf %263, %305 : vector<1x128xf32>
    %324 = arith.mulf %266, %310 : vector<1x128xf32>
    %325 = arith.addf %323, %324 : vector<1x128xf32>
    %326 = arith.addf %325, %276 : vector<1x128xf32>
    %327 = arith.mulf %269, %305 : vector<1x128xf32>
    %328 = arith.mulf %272, %310 : vector<1x128xf32>
    %329 = arith.addf %327, %328 : vector<1x128xf32>
    %330 = arith.addf %329, %280 : vector<1x128xf32>
    %c16_i32 = arith.constant 16 : i32
    %331 = tpu.dynamic_rotate %313 by %c16_i32 dim 1 : vector<1x128xf32>, i32 -> vector<1x128xf32>
    %c16_i32_148 = arith.constant 16 : i32
    %332 = vector.broadcast %c16_i32_148 : i32 to vector<1x128xi32>
    %333 = arith.cmpi sge, %130, %332 : vector<1x128xi32>
    %cst_149 = arith.constant 1.000000e+00 : f32
    %334 = vector.broadcast %cst_149 : f32 to vector<1x128xf32>
    %335 = arith.select %333, %331, %334 : vector<1x128xi1>, vector<1x128xf32>
    %c16_i32_150 = arith.constant 16 : i32
    %336 = tpu.dynamic_rotate %316 by %c16_i32_150 dim 1 : vector<1x128xf32>, i32 -> vector<1x128xf32>
    %c16_i32_151 = arith.constant 16 : i32
    %337 = vector.broadcast %c16_i32_151 : i32 to vector<1x128xi32>
    %338 = arith.cmpi sge, %130, %337 : vector<1x128xi32>
    %cst_152 = arith.constant 0.000000e+00 : f32
    %339 = vector.broadcast %cst_152 : f32 to vector<1x128xf32>
    %340 = arith.select %338, %336, %339 : vector<1x128xi1>, vector<1x128xf32>
    %c16_i32_153 = arith.constant 16 : i32
    %341 = tpu.dynamic_rotate %319 by %c16_i32_153 dim 1 : vector<1x128xf32>, i32 -> vector<1x128xf32>
    %c16_i32_154 = arith.constant 16 : i32
    %342 = vector.broadcast %c16_i32_154 : i32 to vector<1x128xi32>
    %343 = arith.cmpi sge, %130, %342 : vector<1x128xi32>
    %cst_155 = arith.constant 0.000000e+00 : f32
    %344 = vector.broadcast %cst_155 : f32 to vector<1x128xf32>
    %345 = arith.select %343, %341, %344 : vector<1x128xi1>, vector<1x128xf32>
    %c16_i32_156 = arith.constant 16 : i32
    %346 = tpu.dynamic_rotate %322 by %c16_i32_156 dim 1 : vector<1x128xf32>, i32 -> vector<1x128xf32>
    %c16_i32_157 = arith.constant 16 : i32
    %347 = vector.broadcast %c16_i32_157 : i32 to vector<1x128xi32>
    %348 = arith.cmpi sge, %130, %347 : vector<1x128xi32>
    %cst_158 = arith.constant 1.000000e+00 : f32
    %349 = vector.broadcast %cst_158 : f32 to vector<1x128xf32>
    %350 = arith.select %348, %346, %349 : vector<1x128xi1>, vector<1x128xf32>
    %c16_i32_159 = arith.constant 16 : i32
    %351 = tpu.dynamic_rotate %326 by %c16_i32_159 dim 1 : vector<1x128xf32>, i32 -> vector<1x128xf32>
    %c16_i32_160 = arith.constant 16 : i32
    %352 = vector.broadcast %c16_i32_160 : i32 to vector<1x128xi32>
    %353 = arith.cmpi sge, %130, %352 : vector<1x128xi32>
    %cst_161 = arith.constant 0.000000e+00 : f32
    %354 = vector.broadcast %cst_161 : f32 to vector<1x128xf32>
    %355 = arith.select %353, %351, %354 : vector<1x128xi1>, vector<1x128xf32>
    %c16_i32_162 = arith.constant 16 : i32
    %356 = tpu.dynamic_rotate %330 by %c16_i32_162 dim 1 : vector<1x128xf32>, i32 -> vector<1x128xf32>
    %c16_i32_163 = arith.constant 16 : i32
    %357 = vector.broadcast %c16_i32_163 : i32 to vector<1x128xi32>
    %358 = arith.cmpi sge, %130, %357 : vector<1x128xi32>
    %cst_164 = arith.constant 0.000000e+00 : f32
    %359 = vector.broadcast %cst_164 : f32 to vector<1x128xf32>
    %360 = arith.select %358, %356, %359 : vector<1x128xi1>, vector<1x128xf32>
    %361 = arith.mulf %313, %335 : vector<1x128xf32>
    %362 = arith.mulf %316, %345 : vector<1x128xf32>
    %363 = arith.addf %361, %362 : vector<1x128xf32>
    %364 = arith.mulf %313, %340 : vector<1x128xf32>
    %365 = arith.mulf %316, %350 : vector<1x128xf32>
    %366 = arith.addf %364, %365 : vector<1x128xf32>
    %367 = arith.mulf %319, %335 : vector<1x128xf32>
    %368 = arith.mulf %322, %345 : vector<1x128xf32>
    %369 = arith.addf %367, %368 : vector<1x128xf32>
    %370 = arith.mulf %319, %340 : vector<1x128xf32>
    %371 = arith.mulf %322, %350 : vector<1x128xf32>
    %372 = arith.addf %370, %371 : vector<1x128xf32>
    %373 = arith.mulf %313, %355 : vector<1x128xf32>
    %374 = arith.mulf %316, %360 : vector<1x128xf32>
    %375 = arith.addf %373, %374 : vector<1x128xf32>
    %376 = arith.addf %375, %326 : vector<1x128xf32>
    %377 = arith.mulf %319, %355 : vector<1x128xf32>
    %378 = arith.mulf %322, %360 : vector<1x128xf32>
    %379 = arith.addf %377, %378 : vector<1x128xf32>
    %380 = arith.addf %379, %330 : vector<1x128xf32>
    %c32_i32 = arith.constant 32 : i32
    %381 = tpu.dynamic_rotate %363 by %c32_i32 dim 1 : vector<1x128xf32>, i32 -> vector<1x128xf32>
    %c32_i32_165 = arith.constant 32 : i32
    %382 = vector.broadcast %c32_i32_165 : i32 to vector<1x128xi32>
    %383 = arith.cmpi sge, %130, %382 : vector<1x128xi32>
    %cst_166 = arith.constant 1.000000e+00 : f32
    %384 = vector.broadcast %cst_166 : f32 to vector<1x128xf32>
    %385 = arith.select %383, %381, %384 : vector<1x128xi1>, vector<1x128xf32>
    %c32_i32_167 = arith.constant 32 : i32
    %386 = tpu.dynamic_rotate %366 by %c32_i32_167 dim 1 : vector<1x128xf32>, i32 -> vector<1x128xf32>
    %c32_i32_168 = arith.constant 32 : i32
    %387 = vector.broadcast %c32_i32_168 : i32 to vector<1x128xi32>
    %388 = arith.cmpi sge, %130, %387 : vector<1x128xi32>
    %cst_169 = arith.constant 0.000000e+00 : f32
    %389 = vector.broadcast %cst_169 : f32 to vector<1x128xf32>
    %390 = arith.select %388, %386, %389 : vector<1x128xi1>, vector<1x128xf32>
    %c32_i32_170 = arith.constant 32 : i32
    %391 = tpu.dynamic_rotate %369 by %c32_i32_170 dim 1 : vector<1x128xf32>, i32 -> vector<1x128xf32>
    %c32_i32_171 = arith.constant 32 : i32
    %392 = vector.broadcast %c32_i32_171 : i32 to vector<1x128xi32>
    %393 = arith.cmpi sge, %130, %392 : vector<1x128xi32>
    %cst_172 = arith.constant 0.000000e+00 : f32
    %394 = vector.broadcast %cst_172 : f32 to vector<1x128xf32>
    %395 = arith.select %393, %391, %394 : vector<1x128xi1>, vector<1x128xf32>
    %c32_i32_173 = arith.constant 32 : i32
    %396 = tpu.dynamic_rotate %372 by %c32_i32_173 dim 1 : vector<1x128xf32>, i32 -> vector<1x128xf32>
    %c32_i32_174 = arith.constant 32 : i32
    %397 = vector.broadcast %c32_i32_174 : i32 to vector<1x128xi32>
    %398 = arith.cmpi sge, %130, %397 : vector<1x128xi32>
    %cst_175 = arith.constant 1.000000e+00 : f32
    %399 = vector.broadcast %cst_175 : f32 to vector<1x128xf32>
    %400 = arith.select %398, %396, %399 : vector<1x128xi1>, vector<1x128xf32>
    %c32_i32_176 = arith.constant 32 : i32
    %401 = tpu.dynamic_rotate %376 by %c32_i32_176 dim 1 : vector<1x128xf32>, i32 -> vector<1x128xf32>
    %c32_i32_177 = arith.constant 32 : i32
    %402 = vector.broadcast %c32_i32_177 : i32 to vector<1x128xi32>
    %403 = arith.cmpi sge, %130, %402 : vector<1x128xi32>
    %cst_178 = arith.constant 0.000000e+00 : f32
    %404 = vector.broadcast %cst_178 : f32 to vector<1x128xf32>
    %405 = arith.select %403, %401, %404 : vector<1x128xi1>, vector<1x128xf32>
    %c32_i32_179 = arith.constant 32 : i32
    %406 = tpu.dynamic_rotate %380 by %c32_i32_179 dim 1 : vector<1x128xf32>, i32 -> vector<1x128xf32>
    %c32_i32_180 = arith.constant 32 : i32
    %407 = vector.broadcast %c32_i32_180 : i32 to vector<1x128xi32>
    %408 = arith.cmpi sge, %130, %407 : vector<1x128xi32>
    %cst_181 = arith.constant 0.000000e+00 : f32
    %409 = vector.broadcast %cst_181 : f32 to vector<1x128xf32>
    %410 = arith.select %408, %406, %409 : vector<1x128xi1>, vector<1x128xf32>
    %411 = arith.mulf %363, %385 : vector<1x128xf32>
    %412 = arith.mulf %366, %395 : vector<1x128xf32>
    %413 = arith.addf %411, %412 : vector<1x128xf32>
    %414 = arith.mulf %363, %390 : vector<1x128xf32>
    %415 = arith.mulf %366, %400 : vector<1x128xf32>
    %416 = arith.addf %414, %415 : vector<1x128xf32>
    %417 = arith.mulf %369, %385 : vector<1x128xf32>
    %418 = arith.mulf %372, %395 : vector<1x128xf32>
    %419 = arith.addf %417, %418 : vector<1x128xf32>
    %420 = arith.mulf %369, %390 : vector<1x128xf32>
    %421 = arith.mulf %372, %400 : vector<1x128xf32>
    %422 = arith.addf %420, %421 : vector<1x128xf32>
    %423 = arith.mulf %363, %405 : vector<1x128xf32>
    %424 = arith.mulf %366, %410 : vector<1x128xf32>
    %425 = arith.addf %423, %424 : vector<1x128xf32>
    %426 = arith.addf %425, %376 : vector<1x128xf32>
    %427 = arith.mulf %369, %405 : vector<1x128xf32>
    %428 = arith.mulf %372, %410 : vector<1x128xf32>
    %429 = arith.addf %427, %428 : vector<1x128xf32>
    %430 = arith.addf %429, %380 : vector<1x128xf32>
    %c64_i32 = arith.constant 64 : i32
    %431 = tpu.dynamic_rotate %413 by %c64_i32 dim 1 : vector<1x128xf32>, i32 -> vector<1x128xf32>
    %c64_i32_182 = arith.constant 64 : i32
    %432 = vector.broadcast %c64_i32_182 : i32 to vector<1x128xi32>
    %433 = arith.cmpi sge, %130, %432 : vector<1x128xi32>
    %cst_183 = arith.constant 1.000000e+00 : f32
    %434 = vector.broadcast %cst_183 : f32 to vector<1x128xf32>
    %435 = arith.select %433, %431, %434 : vector<1x128xi1>, vector<1x128xf32>
    %c64_i32_184 = arith.constant 64 : i32
    %436 = tpu.dynamic_rotate %416 by %c64_i32_184 dim 1 : vector<1x128xf32>, i32 -> vector<1x128xf32>
    %c64_i32_185 = arith.constant 64 : i32
    %437 = vector.broadcast %c64_i32_185 : i32 to vector<1x128xi32>
    %438 = arith.cmpi sge, %130, %437 : vector<1x128xi32>
    %cst_186 = arith.constant 0.000000e+00 : f32
    %439 = vector.broadcast %cst_186 : f32 to vector<1x128xf32>
    %440 = arith.select %438, %436, %439 : vector<1x128xi1>, vector<1x128xf32>
    %c64_i32_187 = arith.constant 64 : i32
    %441 = tpu.dynamic_rotate %419 by %c64_i32_187 dim 1 : vector<1x128xf32>, i32 -> vector<1x128xf32>
    %c64_i32_188 = arith.constant 64 : i32
    %442 = vector.broadcast %c64_i32_188 : i32 to vector<1x128xi32>
    %443 = arith.cmpi sge, %130, %442 : vector<1x128xi32>
    %cst_189 = arith.constant 0.000000e+00 : f32
    %444 = vector.broadcast %cst_189 : f32 to vector<1x128xf32>
    %445 = arith.select %443, %441, %444 : vector<1x128xi1>, vector<1x128xf32>
    %c64_i32_190 = arith.constant 64 : i32
    %446 = tpu.dynamic_rotate %422 by %c64_i32_190 dim 1 : vector<1x128xf32>, i32 -> vector<1x128xf32>
    %c64_i32_191 = arith.constant 64 : i32
    %447 = vector.broadcast %c64_i32_191 : i32 to vector<1x128xi32>
    %448 = arith.cmpi sge, %130, %447 : vector<1x128xi32>
    %cst_192 = arith.constant 1.000000e+00 : f32
    %449 = vector.broadcast %cst_192 : f32 to vector<1x128xf32>
    %450 = arith.select %448, %446, %449 : vector<1x128xi1>, vector<1x128xf32>
    %c64_i32_193 = arith.constant 64 : i32
    %451 = tpu.dynamic_rotate %426 by %c64_i32_193 dim 1 : vector<1x128xf32>, i32 -> vector<1x128xf32>
    %c64_i32_194 = arith.constant 64 : i32
    %452 = vector.broadcast %c64_i32_194 : i32 to vector<1x128xi32>
    %453 = arith.cmpi sge, %130, %452 : vector<1x128xi32>
    %cst_195 = arith.constant 0.000000e+00 : f32
    %454 = vector.broadcast %cst_195 : f32 to vector<1x128xf32>
    %455 = arith.select %453, %451, %454 : vector<1x128xi1>, vector<1x128xf32>
    %c64_i32_196 = arith.constant 64 : i32
    %456 = tpu.dynamic_rotate %430 by %c64_i32_196 dim 1 : vector<1x128xf32>, i32 -> vector<1x128xf32>
    %c64_i32_197 = arith.constant 64 : i32
    %457 = vector.broadcast %c64_i32_197 : i32 to vector<1x128xi32>
    %458 = arith.cmpi sge, %130, %457 : vector<1x128xi32>
    %cst_198 = arith.constant 0.000000e+00 : f32
    %459 = vector.broadcast %cst_198 : f32 to vector<1x128xf32>
    %460 = arith.select %458, %456, %459 : vector<1x128xi1>, vector<1x128xf32>
    %461 = arith.mulf %413, %435 : vector<1x128xf32>
    %462 = arith.mulf %416, %445 : vector<1x128xf32>
    %463 = arith.addf %461, %462 : vector<1x128xf32>
    %464 = arith.mulf %413, %440 : vector<1x128xf32>
    %465 = arith.mulf %416, %450 : vector<1x128xf32>
    %466 = arith.addf %464, %465 : vector<1x128xf32>
    %467 = arith.mulf %419, %435 : vector<1x128xf32>
    %468 = arith.mulf %422, %445 : vector<1x128xf32>
    %469 = arith.addf %467, %468 : vector<1x128xf32>
    %470 = arith.mulf %419, %440 : vector<1x128xf32>
    %471 = arith.mulf %422, %450 : vector<1x128xf32>
    %472 = arith.addf %470, %471 : vector<1x128xf32>
    %473 = arith.mulf %413, %455 : vector<1x128xf32>
    %474 = arith.mulf %416, %460 : vector<1x128xf32>
    %475 = arith.addf %473, %474 : vector<1x128xf32>
    %476 = arith.addf %475, %426 : vector<1x128xf32>
    %477 = arith.mulf %419, %455 : vector<1x128xf32>
    %478 = arith.mulf %422, %460 : vector<1x128xf32>
    %479 = arith.addf %477, %478 : vector<1x128xf32>
    %480 = arith.addf %479, %430 : vector<1x128xf32>
    %c0_199 = arith.constant 0 : index
    %c0_200 = arith.constant 0 : index
    %481 = vector.load %arg9[%c0_199, %c0_200] : memref<1x128xf32, #tpu.memory_space<vmem>>, vector<1x128xf32>
    %c0_201 = arith.constant 0 : index
    %c0_202 = arith.constant 0 : index
    %482 = vector.load %arg10[%c0_201, %c0_202] : memref<1x128xf32, #tpu.memory_space<vmem>>, vector<1x128xf32>
    %483 = arith.mulf %463, %481 : vector<1x128xf32>
    %484 = arith.mulf %466, %482 : vector<1x128xf32>
    %485 = arith.addf %483, %484 : vector<1x128xf32>
    %486 = arith.addf %485, %476 : vector<1x128xf32>
    %487 = arith.mulf %469, %481 : vector<1x128xf32>
    %488 = arith.mulf %472, %482 : vector<1x128xf32>
    %489 = arith.addf %487, %488 : vector<1x128xf32>
    %490 = arith.addf %489, %480 : vector<1x128xf32>
    %c0_203 = arith.constant 0 : index
    %c0_204 = arith.constant 0 : index
    %c0_205 = arith.constant 0 : index
    %491 = vector.load %arg6[%c0_203, %c0_204, %c0_205] : memref<1x1x128xf32, #tpu.memory_space<vmem>>, vector<1x1x128xf32>
    %492 = vector.shape_cast %491 : vector<1x1x128xf32> to vector<1x128xf32>
    %493 = vector.shape_cast %486 : vector<1x128xf32> to vector<1x1x128xf32>
    tpu.vector_store %arg6[%c0_203, %c0_204, %c0_205], %493 {strides = array<i32>} : memref<1x1x128xf32, #tpu.memory_space<vmem>>, vector<1x1x128xf32>,
    %c0_206 = arith.constant 0 : index
    %c0_207 = arith.constant 0 : index
    %c0_208 = arith.constant 0 : index
    %494 = vector.load %arg7[%c0_206, %c0_207, %c0_208] : memref<1x1x128xf32, #tpu.memory_space<vmem>>, vector<1x1x128xf32>
    %495 = vector.shape_cast %494 : vector<1x1x128xf32> to vector<1x128xf32>
    %496 = vector.shape_cast %490 : vector<1x128xf32> to vector<1x1x128xf32>
    tpu.vector_store %arg7[%c0_206, %c0_207, %c0_208], %496 {strides = array<i32>} : memref<1x1x128xf32, #tpu.memory_space<vmem>>, vector<1x1x128xf32>,
    %cst_209 = arith.constant 0.000000e+00 : f32
    %497 = vector.broadcast %cst_209 : f32 to vector<1x128xf32>
    %498 = vector.extract_strided_slice %486 {offsets = [0, 127], sizes = [1, 1], strides = [1, 1]} : vector<1x128xf32> to vector<1x1xf32>
    %499 = vector.broadcast %498 : vector<1x1xf32> to vector<1x128xf32>
    %500 = arith.addf %499, %497 : vector<1x128xf32>
    %c0_210 = arith.constant 0 : index
    %c0_211 = arith.constant 0 : index
    %501 = vector.load %arg9[%c0_210, %c0_211] : memref<1x128xf32, #tpu.memory_space<vmem>>, vector<1x128xf32>
    tpu.vector_store %arg9[%c0_210, %c0_211], %500 {strides = array<i32>} : memref<1x128xf32, #tpu.memory_space<vmem>>, vector<1x128xf32>,
    %502 = vector.extract_strided_slice %490 {offsets = [0, 127], sizes = [1, 1], strides = [1, 1]} : vector<1x128xf32> to vector<1x1xf32>
    %503 = vector.broadcast %502 : vector<1x1xf32> to vector<1x128xf32>
    %504 = arith.addf %503, %497 : vector<1x128xf32>
    %c0_212 = arith.constant 0 : index
    %c0_213 = arith.constant 0 : index
    %505 = vector.load %arg10[%c0_212, %c0_213] : memref<1x128xf32, #tpu.memory_space<vmem>>, vector<1x128xf32>
    tpu.vector_store %arg10[%c0_212, %c0_213], %504 {strides = array<i32>} : memref<1x128xf32, #tpu.memory_space<vmem>>, vector<1x128xf32>,
    return
  }
  func.func @transform_0(%arg0: i32, %arg1: i32) -> (i32, i32) {
    %c0_i32 = arith.constant 0 : i32
    %c0_i32_0 = arith.constant 0 : i32
    %c0_i32_1 = arith.constant 0 : i32
    return %c0_i32, %c0_i32_0 : i32, i32
  }
  func.func @transform_1(%arg0: i32, %arg1: i32) -> (i32, i32, i32) {
    %c0_i32 = arith.constant 0 : i32
    %c0_i32_0 = arith.constant 0 : i32
    return %arg0, %arg1, %c0_i32 : i32, i32, i32
  }
  func.func @transform_2(%arg0: i32, %arg1: i32) -> (i32, i32, i32) {
    %c0_i32 = arith.constant 0 : i32
    %c0_i32_0 = arith.constant 0 : i32
    %c0_i32_1 = arith.constant 0 : i32
    return %arg0, %c0_i32, %c0_i32_0 : i32, i32, i32
  }
  func.func @transform_3(%arg0: i32, %arg1: i32) -> (i32, i32, i32) {
    %c0_i32 = arith.constant 0 : i32
    %c0_i32_0 = arith.constant 0 : i32
    %c0_i32_1 = arith.constant 0 : i32
    return %arg0, %c0_i32, %c0_i32_0 : i32, i32, i32
  }
  func.func @transform_4(%arg0: i32, %arg1: i32) -> (i32, i32, i32) {
    %c0_i32 = arith.constant 0 : i32
    %c0_i32_0 = arith.constant 0 : i32
    return %arg0, %arg1, %c0_i32 : i32, i32, i32
  }
  func.func @transform_5(%arg0: i32, %arg1: i32) -> (i32, i32, i32) {
    %c0_i32 = arith.constant 0 : i32
    %c0_i32_0 = arith.constant 0 : i32
    return %arg0, %arg1, %c0_i32 : i32, i32, i32
  }
  func.func @transform_6(%arg0: i32, %arg1: i32) -> (i32, i32, i32) {
    %c0_i32 = arith.constant 0 : i32
    %c0_i32_0 = arith.constant 0 : i32
    return %arg0, %arg1, %c0_i32 : i32, i32, i32
  }
}

</mosaic_0001>

<bundles_post_ra>
// kernel: tpu_custom_call.1
= control target key start
LH: loop header
LB: loop body
LE: loop exit
PB: predicated region body
PF: predicated region fallthrough
CT: control target
= control target key end

     0   :  { %s1787_s0 = inlined_call_operand.hbm [shape: f32[5,8], index: 0, kind: input, shape index: {}]   ;;  %s1788_s1 = inlined_call_operand.hbm [shape: s32[2,1,128], index: 1, kind: input, shape index: {}]   ;;  %s1789_s2 = inlined_call_operand.vmem [shape: f32[2,1,128], index: 2, kind: input, shape index: {}]   ;;  %s1790_s3 = inlined_call_operand.vmem [shape: f32[2,1,128], index: 3, kind: input, shape index: {}]   ;;  %s1791_s4 = inlined_call_operand.hbm [shape: f32[2,1,128], index: 4, kind: output, shape index: {0}]   ;;  %s1792_s5 = inlined_call_operand.hbm [shape: f32[2,1,128], index: 5, kind: output, shape index: {1}]   ;;  %s1793_s6 = inlined_call_operand.hbm [shape: f32[2,1,128], index: 6, kind: output, shape index: {2}]  }
   0x1   :  { %1796 = sst [smem:[#allocation17_spill]] %s1787_s0 }
   0x2   :  { %12 = vsyncpa [#allocation7], 0 }
   0x3   :  { %13 = vsyncpa [#allocation5], 0 }
   0x4   :  { %15 = vsyncpa [#allocation5 + $0x1], 0 }
   0x5   :  { %16 = vsyncpa [#allocation6], 0 }
   0x6   :  { %18 = vsyncpa [#allocation6 + $0x1], 0 }
   0x7   :  { %19 = vsyncpa [#allocation11], 0 }
   0x8   :  { %21 = vsyncpa [#allocation11 + $0x1], 0  ;;  %s1346_s21 = smov 0   ;;  %s1348_s22 = smov 0  }
   0x9   :  { %s1350_s23 = smov 0   ;;  %s1352_s24 = smov 0  }
   0xa   :  { %s1354_s25 = smov 0   ;;  %s1356_s26 = smov 0  }
   0xb LB: > { %s1377_s27 = sadd.s32 4294967295, %s1296_s26   ;;  %s1794_s28 = sadd.s32 4294967294, %s1296_s26   ;;  %s1296_s26 = sphi %s1356_s26, %s27_s26   ;;  %s1292_s25 = sphi %s1354_s25, %s1812_s25   ;;  %s1288_s24 = sphi %s1352_s24, %s1811_s24   ;;  %s1284_s23 = sphi %s1350_s23, %s1810_s23   ;;  %s1280_s22 = sphi %s1348_s22, %s1809_s22   ;;  %s1276_s21 = sphi %s1346_s21, %s1808_s21  }
   0xc   : > { %p82_p0 = scmp.ne.s32.totalorder %s1280_s22, %s1276_s21  ;;  %p1795_p1 = scmp.eq.s32.totalorder %s1377_s27, 0 }
   0xd   : > { %p166_p2 = scmp.eq.s32.totalorder %s1794_s28, 1  ;;  %p979_p4 = scmp.ge.s32.totalorder %s1296_s26, 1 }
   0xe   : > { %p1387_p3 = por %p1795_p1, %p82_p0  ;;  %p229_p6 = scmp.lt.s32.totalorder %s1296_s26, 3 }
   0xf   : > { %p1392_p5 = por %p166_p2, %p82_p0  ;;  %s39_s8 = sadd.s32 1, %s1292_s25 }
  0x10   : > { %p1397_p7 = pnand %p979_p4, %p229_p6  ;;  %p41_p11 = scmp.ge.s32.totalorder %s39_s8, 2 }
  0x11   : > { %s1798_s30 = scalar_select %p1392_p5, 1, 0 }
  0x12   : > { %p1036_p9 = pneg %p1397_p7  ;;  %p160_p12 = scmp.eq.s32.totalorder %s1377_s27, 1 }
  0x13   : > { %p76_p13 = scmp.ne.s32.totalorder %s1284_s23, %s1280_s22  ;;  %p77_p0 = scmp.eq.s32.totalorder %s1296_s26, 0 }
  0x14   : > { %p1037_p10 = pnand %p1036_p9, %p1795_p1  ;;  %s1298_s9 = smov [#allocation4]  }
  0x15   : > { %s1800_s0 = sld [smem:[#allocation17_spill]]  ;;  %s1814_s8 = smov (%p41_p11, %s39_s8), 0 }
  0x16   : > { %s69_s12 = sadd.s32 1, %s1284_s23  ;;  %p1417_p2 = por %p160_p12, %p76_p13 }
  0x17   : > { %s64_s14 = ssub.s32 %s1292_s25, %s1814_s8  ;;  %p78_p4 = por %p77_p0, %p76_p13 }
  0x18   : > { %p67_p6 = scmp.eq.s32.totalorder %s64_s14, 0  ;;  %s251_s15 = sand.u32 1, %s1284_s23  }
  0x19   : > { %p1055_p9 = scmp.lt.s32.totalorder %s1296_s26, 2  ;;  %s982_s17 = sshll.u32 %s1292_s25, 4 }
  0x1a   : > { %s1426_s16 = scalar_select %p67_p6, %s1284_s23, %s69_s12  }
  0x1b   : > { %1039 = dma.hbm_to_smem (!%p1037_p10), %s1800_s0, 128, %s1298_s9, [#allocation7]  }
  0x1c   : > { %s254_s18 = scalar_lea.vmem [#allocation8], %s251_s15  ;;  %s260_s10 = scalar_lea.hbm %s1788_s1, %s982_s17 }
  0x1d   : > { %s262_s19 = sshll.u32 %s254_s18, 4  ;;  %p1432_p10 = pnand %p1055_p9, %p78_p4  ;;  %s263_s19 = int_to_ptr.vmem [resolvable:$true] %s262_s19 }
  0x1e   : > { %s252_s28 = scalar_lea.sflag [#allocation5], %s251_s15  ;;  %s1141_s14 = scalar_lea.vmem %s263_s19, 16 }
  0x1f   : > { %p1130_p11 = pneg %p1432_p10  ;;  %p1142_p12 = scmp.ne.s32.totalorder %s263_s19, %s1141_s14 }
  0x20   : > { %s1299_s12 = smov [#allocation8]  }
  0x21   : > { %p1144_p13 = pnand %p1142_p12, %p1130_p11  ;;  %s1146_s0 = sshll.u32 %s1299_s12, 4  ;;  %s1147_s0 = int_to_ptr.vmem [resolvable:$false] %s1146_s0 }
  0x22   : > { %s1148_s18 = scalar_lea.vmem %s1147_s0, 32  ;;  %p1149_p6 = scmp.lt.s32.totalorder %s263_s19, %s1147_s0 }
  0x23   : > { %p1145_p0 = pneg %p1144_p13  ;;  %p1150_p8 = scmp.lt.s32.totalorder %s1148_s18, %s1141_s14 }
  0x25   : > { %p1151_p1 = por %p1150_p8, %p1149_p6 }
  0x27   : > { %p1152_p5 = pnand %p1151_p1, %p1145_p0 }
  0x29   : > { %1155 = shalt.err (!%p1152_p5)
}
  0x2a   : > { %1043 = dma.hbm_to_vmem [thread:$0]  (!%p1432_p10), %s260_s10, 16, %s263_s19, %s252_s28  }
  0x2b   : > { %283 = sbr.rel (%p1397_p7) target bundleno = 1098 (0x44a), region = 36  ;;  %p1803_p4 = scmp.eq.s32.totalorder (!%p1397_p7), %s1377_s27, 0 }
  0x30   : > { %1259 = dma.done.wait (%p1803_p4), [#allocation7], 128   ;;  %p1804_p9 = pmov %p1803_p4 }
  0x31   : > { %s1447_s15 = sand.u32 1, %s1280_s22  }
  0x32   : > { %1261 = vsyncadd (%p1804_p9), [#allocation7], 4294967168  ;;  %s290_s0 = scalar_lea.sflag [#allocation5], %s1447_s15  ;;  %s292_s17 = scalar_lea.vmem [#allocation8], %s1447_s15 }
  0x33   : > { %1263 = dma.done.wait (%p1387_p3), %s290_s0, 16  }
  0x34   : > { %1265 = vsyncadd (%p1387_p3), %s290_s0, 4294967280 }
  0x35   : > { %297 = sfence }
  0x36   : > { %s988_s28 = sld [smem:[#allocation4 + $0x4]]  ;;  %v1455_v0 = vld [vmem:[%s292_s17] sm:$0x1]  ;;  %s1300_s17 = smov 1   ;;  %v460_v61 = vlaneseq }
  0x37   : > { %s995_s7 = sld [smem:[#allocation4 + $0x84]]  ;;  %vm349_vm0 = vcmp.eq.s32.totalorder %v1455_v0, 0  ;;  %vm371_vm1 = vcmp.eq.s32.totalorder %v1455_v0, 1  ;;  %vm393_vm2 = vcmp.eq.s32.totalorder %v1455_v0, 2  ;;  %vm415_vm3 = vcmp.eq.s32.totalorder %v1455_v0, 3  ;;  %p334_p1 = scmp.lt.s32.totalorder %s1288_s24, 1 }
  0x38   : > { %s1002_s19 = sld [smem:[#allocation4 + $0x104]]  ;;  %vm437_vm4 = vcmp.eq.s32.totalorder %v1455_v0, 4  ;;  %v1535_v62 = vand.u32 127, %v460_v61 }
  0x39   : > { %s1009_s20 = sld [smem:[#allocation4 + $0x184]] }
  0x3a   : > { %s1016_s9 = sld [smem:[#allocation4 + $0x204]]  ;;  %vm464_vm5 = vcmp.ge.s32.totalorder %v1535_v62, 1  ;;  %vm503_vm6 = vcmp.ge.s32.totalorder %v1535_v62, 2  ;;  %vm542_vm7 = vcmp.ge.s32.totalorder %v1535_v62, 4  ;;  %vm581_vm8 = vcmp.ge.s32.totalorder %v1535_v62, 8 }
  0x3b   : > { %s350_s10 = sld [smem:[#allocation4]]  ;;  %vm620_vm9 = vcmp.ge.s32.totalorder %v1535_v62, 16  ;;  %vm659_vm10 = vcmp.ge.s32.totalorder %v1535_v62, 32  ;;  %vm698_vm11 = vcmp.ge.s32.totalorder %v1535_v62, 64 }
  0x3c   : > { %v363_v1 = vstv %s988_s28  ;;  %s991_s11 = sld [smem:[#allocation4 + $0x80]] }
  0x3d   : > { %v364_v2 = vsel %vm349_vm0, %v363_v1, 0.0  ;;  %v385_v3 = vstv %s995_s7  ;;  %s998_s29 = sld [smem:[#allocation4 + $0x100]] }
  0x3e   : > { %v386_v4 = vsel %vm371_vm1, %v385_v3, %v364_v2  ;;  %v407_v5 = vstv %s1002_s19  ;;  %s1005_s14 = sld [smem:[#allocation4 + $0x180]] }
  0x3f   : > { %v408_v6 = vsel %vm393_vm2, %v407_v5, %v386_v4  ;;  %v429_v7 = vstv %s1009_s20  ;;  %s1012_s12 = sld [smem:[#allocation4 + $0x200]] }
  0x40   : > { %v430_v8 = vsel %vm415_vm3, %v429_v7, %v408_v6  ;;  %v451_v9 = vstv %s1016_s9  ;;  %s989_s18 = sld [smem:[#allocation4 + $0x5]] }
  0x41   : > { %v1472_v10 = vsel %vm437_vm4, %v451_v9, %v430_v8  ;;  %v351_v11 = vstv %s350_s10  ;;  %s996_s0 = sld [smem:[#allocation4 + $0x85]] }
  0x42   : > { %475 = vrot.lane.b32.xlu0 %v1472_v10, %s1300_s17  ;;  %v352_v12 = vsel %vm349_vm0, %v351_v11, 0.0  ;;  %v373_v13 = vstv %s991_s11  ;;  %s1003_s28 = sld [smem:[#allocation4 + $0x105]] }
  0x43   : > { %v374_v14 = vsel %vm371_vm1, %v373_v13, %v352_v12  ;;  %v395_v15 = vstv %s998_s29  ;;  %s1010_s7 = sld [smem:[#allocation4 + $0x185]] }
  0x44   : > { %v396_v16 = vsel %vm393_vm2, %v395_v15, %v374_v14  ;;  %v417_v17 = vstv %s1005_s14  ;;  %s1017_s19 = sld [smem:[#allocation4 + $0x205]] }
  0x45   : > { %v418_v18 = vsel %vm415_vm3, %v417_v17, %v396_v16  ;;  %v439_v19 = vstv %s1012_s12  ;;  %s985_s20 = sld [smem:[#allocation4 + $0x1]] }
  0x46   : > { %v1486_v20 = vsel %vm437_vm4, %v439_v19, %v418_v18  ;;  %v366_v21 = vstv %s989_s18  ;;  %s992_s9 = sld [smem:[#allocation4 + $0x81]] }
  0x47   : > { %462 = vrot.lane.b32.xlu1 %v1486_v20, %s1300_s17  ;;  %v367_v22 = vsel %vm349_vm0, %v366_v21, 0.0  ;;  %v388_v23 = vstv %s996_s0  ;;  %s999_s10 = sld [smem:[#allocation4 + $0x101]] }
  0x48   : > { %v389_v24 = vsel %vm371_vm1, %v388_v23, %v367_v22  ;;  %v410_v25 = vstv %s1003_s28  ;;  %s1006_s11 = sld [smem:[#allocation4 + $0x181]] }
  0x49   : > { %v411_v26 = vsel %vm393_vm2, %v410_v25, %v389_v24  ;;  %v432_v27 = vstv %s1010_s7  ;;  %s1013_s29 = sld [smem:[#allocation4 + $0x201]] }
  0x4a   : > { %v433_v28 = vsel %vm415_vm3, %v432_v27, %v411_v26  ;;  %v454_v29 = vstv %s1017_s19  ;;  %s986_s14 = sld [smem:[#allocation4 + $0x2]] }
  0x4b   : > { %v455_v30 = vsel %vm437_vm4, %v454_v29, %v433_v28  ;;  %v354_v31 = vstv %s985_s20  ;;  %s993_s12 = sld [smem:[#allocation4 + $0x82]] }
  0x4c   : > { %478 = vrot.lane.b32.xlu0 %v455_v30, %s1300_s17  ;;  %v355_v32 = vsel %vm349_vm0, %v354_v31, 0.0  ;;  %v376_v33 = vstv %s992_s9  ;;  %s1000_s18 = sld [smem:[#allocation4 + $0x102]] }
  0x4d   : > { %v377_v34 = vsel %vm371_vm1, %v376_v33, %v355_v32  ;;  %v398_v35 = vstv %s999_s10  ;;  %s1007_s0 = sld [smem:[#allocation4 + $0x182]] }
  0x4e   : > { %v399_v36 = vsel %vm393_vm2, %v398_v35, %v377_v34  ;;  %v420_v37 = vstv %s1006_s11  ;;  %s1014_s28 = sld [smem:[#allocation4 + $0x202]]  ;;  %s1302_s11 = smov 4  }
  0x4f   : > { %v421_v38 = vsel %vm415_vm3, %v420_v37, %v399_v36  ;;  %v442_v39 = vstv %s1013_s29  ;;  %s987_s7 = sld [smem:[#allocation4 + $0x3]]  ;;  %s1303_s29 = smov 8  }
  0x50   : > { %v443_v40 = vsel %vm437_vm4, %v442_v39, %v421_v38  ;;  %v357_v41 = vstv %s986_s14  ;;  %s994_s19 = sld [smem:[#allocation4 + $0x83]]  ;;  %s1304_s14 = smov 16  }
  0x51   : > { %466 = vrot.lane.b32.xlu1 %v443_v40, %s1300_s17  ;;  %v358_v42 = vsel %vm349_vm0, %v357_v41, 0.0  ;;  %v379_v43 = vstv %s993_s12  ;;  %s1001_s20 = sld [smem:[#allocation4 + $0x103]]  ;;  %s1305_s12 = smov 32  }
  0x52   : > { %v380_v44 = vsel %vm371_vm1, %v379_v43, %v358_v42  ;;  %v401_v45 = vstv %s1000_s18  ;;  %s1008_s9 = sld [smem:[#allocation4 + $0x183]] }
  0x53   : > { %v402_v46 = vsel %vm393_vm2, %v401_v45, %v380_v44  ;;  %v423_v47 = vstv %s1007_s0  ;;  %s1015_s10 = sld [smem:[#allocation4 + $0x203]]  ;;  %s1658_s0 = sshll.u32 %s1288_s24, 4 }
  0x54   : > { %v424_v48 = vsel %vm415_vm3, %v423_v47, %v402_v46  ;;  %v445_v49 = vstv %s1014_s28  ;;  %s335_s18 = scalar_select %p334_p1, %s1288_s24, 1 }
  0x55   : > { %v446_v50 = vsel %vm437_vm4, %v445_v49, %v424_v48  ;;  %v360_v51 = vstv %s987_s7 }
  0x56   : > { %469 = vrot.lane.b32.xlu0 %v446_v50, %s1300_s17  ;;  %v361_v52 = vsel %vm349_vm0, %v360_v51, 0.0  ;;  %v382_v53 = vstv %s994_s19  ;;  %s336_s7 = scalar_lea.vmem %s1789_s2, %s335_s18  ;;  %s1667_s19 = scalar_lea.hbm %s1792_s5, %s1658_s0 }
  0x57   : > { %v383_v54 = vsel %vm371_vm1, %v382_v53, %v361_v52  ;;  %v404_v55 = vstv %s1001_s20  ;;  %s321_s20 = scalar_lea.vmem [#allocation9], %s1447_s15 }
  0x58   : > { %v405_v56 = vsel %vm393_vm2, %v404_v55, %v383_v54  ;;  %v426_v57 = vstv %s1008_s9  ;;  %s339_s9 = scalar_lea.vmem %s1790_s3, %s335_s18  ;;  %s773_s18 = sand.u32 1, %s1377_s27  }
  0x59   : > { %v427_v58 = vsel %vm415_vm3, %v426_v57, %v405_v56  ;;  %v448_v59 = vstv %s1015_s10  ;;  %s1306_s10 = smov 64   ;;  %s327_s27 = scalar_lea.vmem [#allocation10], %s1447_s15 }
  0x5a   : > { %v449_v60 = vsel %vm437_vm4, %v448_v59, %v427_v58  ;;  %s805_s24 = sshll.u32 %s327_s27, 4  ;;  %s1672_s24 = int_to_ptr.vmem [resolvable:$true] %s805_s24 }
  0x5b   : > { %472 = vrot.lane.b32.xlu1 %v449_v60, %s1300_s17  ;;  %s1301_s17 = smov 2  }
  0xb4   : > { %v476_v63 = vpop.permute.xlu0 %475 }
  0xb5   : > { %v477_v1 = vsel %vm464_vm5, %v476_v63, 0.0 }
  0xb6   : > { %v493_v4 = vmul.f32 %v477_v1, %v1486_v20  ;;  %v497_v5 = vmul.f32 %v477_v1, %v446_v50 }
  0xb9   : > { %v463_v8 = vpop.permute.xlu1 %462 }
  0xba   : > { %v465_v14 = vsel %vm464_vm5, %v463_v8, 1.0 }
  0xbb   : > { %v481_v18 = vmul.f32 %v465_v14, %v1486_v20  ;;  %v487_v24 = vmul.f32 %v465_v14, %v446_v50 }
  0xbe   : > { %v479_v2 = vpop.permute.xlu0 %478 }
  0xbf   : > { %v480_v3 = vsel %vm464_vm5, %v479_v2, 0.0 }
  0xc0   : > { %v494_v6 = vmul.f32 %v480_v3, %v443_v40  ;;  %v498_v7 = vmul.f32 %v480_v3, %v449_v60 }
  0xc2   : > { %v495_v9 = vadd.f32 %v494_v6, %v493_v4  ;;  %v499_v11 = vadd.f32 %v498_v7, %v497_v5 }
  0xc3   : > { %v467_v15 = vpop.permute.xlu1 %466 }
  0xc4   : > { %v500_v12 = vadd.f32 %v499_v11, %v455_v30  ;;  %v496_v13 = vadd.f32 %v495_v9, %v1472_v10  ;;  %v468_v21 = vsel %vm464_vm5, %v467_v15, 0.0 }
  0xc5   : > { %v484_v26 = vmul.f32 %v468_v21, %v1486_v20  ;;  %v490_v31 = vmul.f32 %v468_v21, %v446_v50 }
  0xc6   : > { %517 = vrot.lane.b32.xlu1 %v500_v12, %s1301_s17  ;;  %514 = vrot.lane.b32.xlu0 %v496_v13, %s1301_s17 }
  0xc8   : > { %v470_v16 = vpop.permute.xlu0 %469 }
  0xc9   : > { %v471_v17 = vsel %vm464_vm5, %v470_v16, 0.0 }
  0xca   : > { %v482_v19 = vmul.f32 %v471_v17, %v443_v40  ;;  %v488_v23 = vmul.f32 %v471_v17, %v449_v60 }
  0xcc   : > { %v483_v22 = vadd.f32 %v482_v19, %v481_v18  ;;  %v489_v28 = vadd.f32 %v488_v23, %v487_v24 }
  0xcd   : > { %v473_v10 = vpop.permute.xlu1 %472 }
  0xce   : > { %v474_v25 = vsel %vm464_vm5, %v473_v10, 1.0  ;;  %501 = vrot.lane.b32.xlu0 %v483_v22, %s1301_s17 }
  0xcf   : > { %v485_v27 = vmul.f32 %v474_v25, %v443_v40  ;;  %v491_v30 = vmul.f32 %v474_v25, %v449_v60 }
  0xd1   : > { %v486_v29 = vadd.f32 %v485_v27, %v484_v26  ;;  %v492_v32 = vadd.f32 %v491_v30, %v490_v31 }
  0xd2   : > { %508 = vrot.lane.b32.xlu0 %v489_v28, %s1301_s17 }
  0xd3   : > { %505 = vrot.lane.b32.xlu1 %v486_v29, %s1301_s17 }
  0xd7   : > { %511 = vrot.lane.b32.xlu1 %v492_v32, %s1301_s17  ;;  %s990_s17 = sld [smem:[#allocation4 + $0x6]] }
 0x138   : > { %v518_v33 = vpop.permute.xlu1 %517  ;;  %v515_v34 = vpop.permute.xlu0 %514 }
 0x139   : > { %v519_v35 = vsel %vm503_vm6, %v518_v33, 0.0  ;;  %v516_v36 = vsel %vm503_vm6, %v515_v34, 0.0 }
 0x13a   : > { %v533_v20 = vmul.f32 %v519_v35, %v486_v29  ;;  %v537_v37 = vmul.f32 %v519_v35, %v492_v32  ;;  %v532_v38 = vmul.f32 %v516_v36, %v483_v22  ;;  %v536_v39 = vmul.f32 %v516_v36, %v489_v28 }
 0x13c   : > { %v534_v40 = vadd.f32 %v533_v20, %v532_v38  ;;  %v538_v41 = vadd.f32 %v537_v37, %v536_v39 }
 0x13e   : > { %v1559_v42 = vadd.f32 %v538_v41, %v500_v12  ;;  %v535_v43 = vadd.f32 %v534_v40, %v496_v13 }
 0x140   : > { %v502_v44 = vpop.permute.xlu0 %501  ;;  %556 = vrot.lane.b32.xlu1 %v1559_v42, %s1302_s11  ;;  %553 = vrot.lane.b32.xlu0 %v535_v43, %s1302_s11 }
 0x141   : > { %v504_v45 = vsel %vm503_vm6, %v502_v44, 1.0 }
 0x142   : > { %v520_v49 = vmul.f32 %v504_v45, %v483_v22  ;;  %v526_v55 = vmul.f32 %v504_v45, %v489_v28 }
 0x144   : > { %v509_v46 = vpop.permute.xlu0 %508 }
 0x145   : > { %v506_v47 = vpop.permute.xlu1 %505  ;;  %v510_v48 = vsel %vm503_vm6, %v509_v46, 0.0 }
 0x146   : > { %v521_v50 = vmul.f32 %v510_v48, %v486_v29  ;;  %v507_v51 = vsel %vm503_vm6, %v506_v47, 0.0  ;;  %v527_v53 = vmul.f32 %v510_v48, %v492_v32 }
 0x147   : > { %v523_v57 = vmul.f32 %v507_v51, %v483_v22  ;;  %v529_v1 = vmul.f32 %v507_v51, %v489_v28 }
 0x148   : > { %v522_v52 = vadd.f32 %v521_v50, %v520_v49  ;;  %v528_v59 = vadd.f32 %v527_v53, %v526_v55 }
 0x149   : > { %v512_v54 = vpop.permute.xlu1 %511 }
 0x14a   : > { %v513_v56 = vsel %vm503_vm6, %v512_v54, 1.0  ;;  %540 = vrot.lane.b32.xlu0 %v522_v52, %s1302_s11 }
 0x14b   : > { %v524_v58 = vmul.f32 %v513_v56, %v486_v29  ;;  %v530_v63 = vmul.f32 %v513_v56, %v492_v32 }
 0x14d   : > { %v525_v60 = vadd.f32 %v524_v58, %v523_v57  ;;  %v531_v2 = vadd.f32 %v530_v63, %v529_v1 }
 0x14e   : > { %547 = vrot.lane.b32.xlu0 %v528_v59, %s1302_s11 }
 0x14f   : > { %544 = vrot.lane.b32.xlu1 %v525_v60, %s1302_s11 }
 0x153   : > { %550 = vrot.lane.b32.xlu1 %v531_v2, %s1302_s11  ;;  %s997_s11 = sld [smem:[#allocation4 + $0x86]] }
 0x159   : > { %v391_v62 = vstv %s997_s11  ;;  %s1685_s11 = scalar_lea.sflag [#allocation11], %s773_s18 }
 0x1b2   : > { %v554_v3 = vpop.permute.xlu0 %553  ;;  %v557_v4 = vpop.permute.xlu1 %556 }
 0x1b3   : > { %v558_v6 = vsel %vm542_vm7, %v557_v4, 0.0  ;;  %v555_v7 = vsel %vm542_vm7, %v554_v3, 0.0 }
 0x1b4   : > { %v572_v9 = vmul.f32 %v558_v6, %v525_v60  ;;  %v571_v11 = vmul.f32 %v555_v7, %v522_v52  ;;  %v576_v21 = vmul.f32 %v558_v6, %v531_v2  ;;  %v575_v22 = vmul.f32 %v555_v7, %v528_v59 }
 0x1b6   : > { %v573_v17 = vadd.f32 %v572_v9, %v571_v11  ;;  %v577_v28 = vadd.f32 %v576_v21, %v575_v22 }
 0x1b8   : > { %v574_v27 = vadd.f32 %v573_v17, %v535_v43  ;;  %v578_v33 = vadd.f32 %v577_v28, %v1559_v42 }
 0x1bc   : > { %v541_v5 = vpop.permute.xlu0 %540 }
 0x1bd   : > { %v543_v8 = vsel %vm542_vm7, %v541_v5, 1.0 }
 0x1be   : > { %v559_v15 = vmul.f32 %v543_v8, %v522_v52  ;;  %v565_v30 = vmul.f32 %v543_v8, %v528_v59 }
 0x1c0   : > { %v548_v12 = vpop.permute.xlu0 %547 }
 0x1c1   : > { %v545_v13 = vpop.permute.xlu1 %544  ;;  %v549_v14 = vsel %vm542_vm7, %v548_v12, 0.0 }
 0x1c2   : > { %v560_v16 = vmul.f32 %v549_v14, %v525_v60  ;;  %v546_v18 = vsel %vm542_vm7, %v545_v13, 0.0  ;;  %v566_v26 = vmul.f32 %v549_v14, %v531_v2 }
 0x1c3   : > { %v562_v24 = vmul.f32 %v546_v18, %v522_v52  ;;  %v568_v34 = vmul.f32 %v546_v18, %v528_v59 }
 0x1c4   : > { %v561_v19 = vadd.f32 %v560_v16, %v559_v15  ;;  %v567_v31 = vadd.f32 %v566_v26, %v565_v30 }
 0x1c5   : > { %v551_v23 = vpop.permute.xlu1 %550 }
 0x1c6   : > { %v552_v10 = vsel %vm542_vm7, %v551_v23, 1.0  ;;  %579 = vrot.lane.b32.xlu0 %v561_v19, %s1303_s29 }
 0x1c7   : > { %v563_v25 = vmul.f32 %v552_v10, %v525_v60  ;;  %v569_v32 = vmul.f32 %v552_v10, %v531_v2 }
 0x1c9   : > { %v564_v29 = vadd.f32 %v563_v25, %v562_v24  ;;  %v570_v35 = vadd.f32 %v569_v32, %v568_v34 }
 0x1ca   : > { %592 = vrot.lane.b32.xlu0 %v574_v27, %s1303_s29 }
 0x1cb   : > { %583 = vrot.lane.b32.xlu1 %v564_v29, %s1303_s29 }
 0x1ce   : > { %586 = vrot.lane.b32.xlu0 %v567_v31, %s1303_s29 }
 0x1cf   : > { %595 = vrot.lane.b32.xlu1 %v578_v33, %s1303_s29 }
 0x1d3   : > { %589 = vrot.lane.b32.xlu1 %v570_v35, %s1303_s29  ;;  %s1004_s29 = sld [smem:[#allocation4 + $0x106]] }
 0x238   : > { %v580_v36 = vpop.permute.xlu0 %579 }
 0x239   : > { %v582_v39 = vsel %vm581_vm8, %v580_v36, 1.0 }
 0x23a   : > { %v598_v44 = vmul.f32 %v582_v39, %v561_v19  ;;  %v604_v63 = vmul.f32 %v582_v39, %v567_v31 }
 0x23c   : > { %v593_v20 = vpop.permute.xlu0 %592 }
 0x23d   : > { %v584_v37 = vpop.permute.xlu1 %583  ;;  %v594_v38 = vsel %vm581_vm8, %v593_v20, 0.0 }
 0x23e   : > { %v610_v43 = vmul.f32 %v594_v38, %v561_v19  ;;  %v585_v48 = vsel %vm581_vm8, %v584_v37, 0.0  ;;  %v614_v52 = vmul.f32 %v594_v38, %v567_v31 }
 0x23f   : > { %v601_v55 = vmul.f32 %v585_v48, %v561_v19  ;;  %v607_v4 = vmul.f32 %v585_v48, %v567_v31 }
 0x240   : > { %v587_v40 = vpop.permute.xlu0 %586 }
 0x241   : > { %v596_v41 = vpop.permute.xlu1 %595  ;;  %v588_v42 = vsel %vm581_vm8, %v587_v40, 0.0 }
 0x242   : > { %v597_v45 = vsel %vm581_vm8, %v596_v41, 0.0  ;;  %v599_v46 = vmul.f32 %v588_v42, %v564_v29  ;;  %v605_v57 = vmul.f32 %v588_v42, %v570_v35  ;;  %v344_v41 = vld [vmem:[%s336_s7] sm:$0x1] }
 0x243   : > { %v611_v47 = vmul.f32 %v597_v45, %v564_v29  ;;  %v615_v50 = vmul.f32 %v597_v45, %v570_v35  ;;  %345 = vst [vmem:[#allocation2] sm:$0x1] %v344_v41 }
 0x244   : > { %v600_v49 = vadd.f32 %v599_v46, %v598_v44  ;;  %v606_v1 = vadd.f32 %v605_v57, %v604_v63 }
 0x245   : > { %v612_v51 = vadd.f32 %v611_v47, %v610_v43  ;;  %v590_v53 = vpop.permute.xlu1 %589  ;;  %v616_v59 = vadd.f32 %v615_v50, %v614_v52  ;;  %v346_v43 = vld [vmem:[%s339_s9] sm:$0x1] }
 0x246   : > { %v591_v54 = vsel %vm581_vm8, %v590_v53, 1.0  ;;  %618 = vrot.lane.b32.xlu0 %v600_v49, %s1304_s14  ;;  %347 = vst [vmem:[#allocation3] sm:$0x1] %v346_v43 }
 0x247   : > { %v602_v56 = vmul.f32 %v591_v54, %v564_v29  ;;  %v613_v58 = vadd.f32 %v612_v51, %v574_v27  ;;  %v608_v2 = vmul.f32 %v591_v54, %v570_v35  ;;  %v617_v3 = vadd.f32 %v616_v59, %v578_v33 }
 0x249   : > { %v603_v60 = vadd.f32 %v602_v56, %v601_v55  ;;  %v609_v5 = vadd.f32 %v608_v2, %v607_v4 }
 0x24a   : > { %631 = vrot.lane.b32.xlu0 %v613_v58, %s1304_s14 }
 0x24b   : > { %622 = vrot.lane.b32.xlu1 %v603_v60, %s1304_s14 }
 0x24e   : > { %625 = vrot.lane.b32.xlu0 %v606_v1, %s1304_s14 }
 0x24f   : > { %634 = vrot.lane.b32.xlu1 %v617_v3, %s1304_s14 }
 0x253   : > { %628 = vrot.lane.b32.xlu1 %v609_v5, %s1304_s14  ;;  %s1011_s14 = sld [smem:[#allocation4 + $0x186]] }
 0x2b8   : > { %v619_v6 = vpop.permute.xlu0 %618 }
 0x2b9   : > { %v621_v9 = vsel %vm620_vm9, %v619_v6, 1.0  ;;  %v1307_v6 = vmov 127  }
 0x2ba   : > { %v637_v15 = vmul.f32 %v621_v9, %v600_v49  ;;  %v643_v24 = vmul.f32 %v621_v9, %v606_v1  ;;  %1116 = vset.pattern.permute.xlu1 %v1307_v6  ;;  %1115 = vset.pattern.permute.xlu0 %v1307_v6 }
 0x2bc   : > { %v632_v7 = vpop.permute.xlu0 %631 }
 0x2bd   : > { %v623_v8 = vpop.permute.xlu1 %622  ;;  %v633_v12 = vsel %vm620_vm9, %v632_v7, 0.0 }
 0x2be   : > { %v624_v18 = vsel %vm620_vm9, %v623_v8, 0.0  ;;  %v649_v19 = vmul.f32 %v633_v12, %v600_v49  ;;  %v653_v30 = vmul.f32 %v633_v12, %v606_v1 }
 0x2bf   : > { %v640_v26 = vmul.f32 %v624_v18, %v600_v49  ;;  %v646_v34 = vmul.f32 %v624_v18, %v606_v1 }
 0x2c0   : > { %v626_v11 = vpop.permute.xlu0 %625 }
 0x2c1   : > { %v635_v13 = vpop.permute.xlu1 %634  ;;  %v627_v14 = vsel %vm620_vm9, %v626_v11, 0.0 }
 0x2c2   : > { %v636_v16 = vsel %vm620_vm9, %v635_v13, 0.0  ;;  %v638_v17 = vmul.f32 %v627_v14, %v603_v60  ;;  %v644_v23 = vmul.f32 %v627_v14, %v609_v5 }
 0x2c3   : > { %v650_v21 = vmul.f32 %v636_v16, %v603_v60  ;;  %v654_v31 = vmul.f32 %v636_v16, %v609_v5 }
 0x2c4   : > { %v639_v22 = vadd.f32 %v638_v17, %v637_v15  ;;  %v645_v29 = vadd.f32 %v644_v23, %v643_v24  ;;  %v735_v24 = vld [vmem:[#allocation2] sm:$0x1] }
 0x2c5   : > { %v629_v10 = vpop.permute.xlu1 %628  ;;  %v651_v28 = vadd.f32 %v650_v21, %v649_v19  ;;  %v655_v36 = vadd.f32 %v654_v31, %v653_v30 }
 0x2c6   : > { %v630_v25 = vsel %vm620_vm9, %v629_v10, 1.0  ;;  %657 = vrot.lane.b32.xlu0 %v639_v22, %s1305_s12 }
 0x2c7   : > { %v641_v27 = vmul.f32 %v630_v25, %v603_v60  ;;  %v647_v33 = vmul.f32 %v630_v25, %v609_v5  ;;  %v652_v35 = vadd.f32 %v651_v28, %v613_v58  ;;  %v656_v37 = vadd.f32 %v655_v36, %v617_v3 }
 0x2c9   : > { %v642_v32 = vadd.f32 %v641_v27, %v640_v26  ;;  %v648_v20 = vadd.f32 %v647_v33, %v646_v34  ;;  %v736_v34 = vld [vmem:[#allocation3] sm:$0x1] }
 0x2ca   : > { %664 = vrot.lane.b32.xlu0 %v645_v29, %s1305_s12 }
 0x2cb   : > { %661 = vrot.lane.b32.xlu1 %v642_v32, %s1305_s12 }
 0x2ce   : > { %670 = vrot.lane.b32.xlu0 %v652_v35, %s1305_s12 }
 0x2cf   : > { %667 = vrot.lane.b32.xlu1 %v648_v20, %s1305_s12 }
 0x2d3   : > { %673 = vrot.lane.b32.xlu1 %v656_v37, %s1305_s12  ;;  %s1650_s12 = sld [smem:[#allocation4 + $0x206]] }
 0x338   : > { %v658_v38 = vpop.permute.xlu0 %657 }
 0x339   : > { %v660_v39 = vsel %vm659_vm10, %v658_v38, 1.0 }
 0x33a   : > { %v676_v45 = vmul.f32 %v660_v39, %v639_v22  ;;  %v682_v52 = vmul.f32 %v660_v39, %v645_v29 }
 0x33c   : > { %v665_v40 = vpop.permute.xlu0 %664 }
 0x33d   : > { %v662_v42 = vpop.permute.xlu1 %661  ;;  %v666_v44 = vsel %vm659_vm10, %v665_v40, 0.0 }
 0x33e   : > { %v677_v46 = vmul.f32 %v666_v44, %v642_v32  ;;  %v663_v47 = vsel %vm659_vm10, %v662_v42, 0.0  ;;  %v683_v49 = vmul.f32 %v666_v44, %v648_v20 }
 0x33f   : > { %v679_v55 = vmul.f32 %v663_v47, %v639_v22  ;;  %v685_v3 = vmul.f32 %v663_v47, %v645_v29 }
 0x340   : > { %v1625_v48 = vadd.f32 %v677_v46, %v676_v45  ;;  %v671_v50 = vpop.permute.xlu0 %670  ;;  %v684_v57 = vadd.f32 %v683_v49, %v682_v52  ;;  %v369_v46 = vstv %s990_s17  ;;  %v413_v52 = vstv %s1004_s29  ;;  %s1681_s17 = scalar_lea.hbm %s1791_s4, %s1658_s0  ;;  %s1156_s29 = scalar_lea.vmem %s1672_s24, 16 }
 0x341   : > { %v668_v51 = vpop.permute.xlu1 %667  ;;  %v672_v54 = vsel %vm659_vm10, %v671_v50, 0.0  ;;  %p1157_p3 = scmp.ne.s32.totalorder %s1672_s24, %s1156_s29 }
 0x342   : > { %v669_v53 = vsel %vm659_vm10, %v668_v51, 1.0  ;;  %696 = vrot.lane.b32.xlu0 %v1625_v48, %s1306_s10  ;;  %v688_v63 = vmul.f32 %v672_v54, %v639_v22  ;;  %v692_v1 = vmul.f32 %v672_v54, %v645_v29  ;;  %v370_v51 = vsel %vm349_vm0, %v369_v46, 0.0 }
 0x343   : > { %v680_v56 = vmul.f32 %v669_v53, %v642_v32  ;;  %v686_v59 = vmul.f32 %v669_v53, %v648_v20  ;;  %p1158_p5 = pnand %p1157_p3, %p1417_p2 }
 0x345   : > { %v681_v58 = vadd.f32 %v680_v56, %v679_v55  ;;  %v674_v60 = vpop.permute.xlu1 %673  ;;  %v687_v7 = vadd.f32 %v686_v59, %v685_v3  ;;  %v392_v55 = vsel %vm371_vm1, %v391_v62, %v370_v51  ;;  %v435_v56 = vstv %s1011_s14  ;;  %p1159_p7 = pneg %p1158_p5  ;;  %s1308_s14 = smov [#allocation10]  }
 0x346   : > { %v675_v2 = vsel %vm659_vm10, %v674_v60, 0.0  ;;  %703 = vrot.lane.b32.xlu0 %v684_v57, %s1306_s10 }
 0x347   : > { %v689_v4 = vmul.f32 %v675_v2, %v642_v32  ;;  %v693_v5 = vmul.f32 %v675_v2, %v648_v20  ;;  %700 = vrot.lane.b32.xlu1 %v681_v58, %s1306_s10 }
 0x349   : > { %v690_v8 = vadd.f32 %v689_v4, %v688_v63  ;;  %v694_v9 = vadd.f32 %v693_v5, %v692_v1 }
 0x34b   : > { %706 = vrot.lane.b32.xlu1 %v687_v7, %s1306_s10  ;;  %v691_v11 = vadd.f32 %v690_v8, %v652_v35  ;;  %v695_v12 = vadd.f32 %v694_v9, %v656_v37 }
 0x34d   : > { %709 = vrot.lane.b32.xlu0 %v691_v11, %s1306_s10 }
 0x34f   : > { %712 = vrot.lane.b32.xlu1 %v695_v12, %s1306_s10 }
 0x3b4   : > { %v697_v13 = vpop.permute.xlu0 %696 }
 0x3b5   : > { %v699_v14 = vsel %vm698_vm11, %v697_v13, 1.0 }
 0x3b6   : > { %v721_v18 = vmul.f32 %v699_v14, %v684_v57  ;;  %v715_v22 = vmul.f32 %v699_v14, %v1625_v48 }
 0x3b8   : > { %v704_v15 = vpop.permute.xlu0 %703 }
 0x3b9   : > { %v701_v16 = vpop.permute.xlu1 %700  ;;  %v705_v17 = vsel %vm698_vm11, %v704_v15, 0.0 }
 0x3ba   : > { %v716_v19 = vmul.f32 %v705_v17, %v681_v58  ;;  %v722_v21 = vmul.f32 %v705_v17, %v687_v7  ;;  %v702_v23 = vsel %vm698_vm11, %v701_v16, 0.0 }
 0x3bb   : > { %v718_v28 = vmul.f32 %v702_v23, %v1625_v48  ;;  %v724_v29 = vmul.f32 %v702_v23, %v684_v57 }
 0x3bc   : > { %v723_v10 = vadd.f32 %v722_v21, %v721_v18  ;;  %v717_v26 = vadd.f32 %v716_v19, %v715_v22 }
 0x3bd   : > { %v707_v25 = vpop.permute.xlu1 %706 }
 0x3be   : > { %v708_v27 = vsel %vm698_vm11, %v707_v25, 1.0  ;;  %v741_v33 = vmul.f32 %v735_v24, %v723_v10  ;;  %v737_v40 = vmul.f32 %v735_v24, %v717_v26 }
 0x3bf   : > { %v719_v30 = vmul.f32 %v708_v27, %v681_v58  ;;  %v725_v31 = vmul.f32 %v708_v27, %v687_v7  ;;  %v710_v32 = vpop.permute.xlu0 %709 }
 0x3c0   : > { %v711_v35 = vsel %vm698_vm11, %v710_v32, 0.0 }
 0x3c1   : > { %v720_v36 = vadd.f32 %v719_v30, %v718_v28  ;;  %v726_v20 = vadd.f32 %v725_v31, %v724_v29  ;;  %v727_v37 = vmul.f32 %v711_v35, %v1625_v48  ;;  %v731_v38 = vmul.f32 %v711_v35, %v684_v57  ;;  %v713_v39 = vpop.permute.xlu1 %712 }
 0x3c2   : > { %v714_v41 = vsel %vm698_vm11, %v713_v39, 0.0  ;;  %v414_v57 = vsel %vm393_vm2, %v413_v52, %v392_v55 }
 0x3c3   : > { %v738_v43 = vmul.f32 %v736_v34, %v720_v36  ;;  %v742_v42 = vmul.f32 %v736_v34, %v726_v20  ;;  %v728_v44 = vmul.f32 %v714_v41, %v681_v58  ;;  %v732_v45 = vmul.f32 %v714_v41, %v687_v7 }
 0x3c4   : > { %v457_v58 = vstv %s1650_s12  ;;  %v436_v63 = vsel %vm415_vm3, %v435_v56, %v414_v57  ;;  %s1160_s12 = sshll.u32 %s1308_s14, 4  ;;  %s1161_s12 = int_to_ptr.vmem [resolvable:$false] %s1160_s12 }
 0x3c5   : > { %v729_v47 = vadd.f32 %v728_v44, %v727_v37  ;;  %v733_v49 = vadd.f32 %v732_v45, %v731_v38  ;;  %v743_v48 = vadd.f32 %v742_v42, %v741_v33  ;;  %v739_v50 = vadd.f32 %v738_v43, %v737_v40  ;;  %s1162_s28 = scalar_lea.vmem %s1161_s12, 32  ;;  %p1163_p8 = scmp.lt.s32.totalorder %s1672_s24, %s1161_s12 }
 0x3c6   : > { %v458_v1 = vsel %vm437_vm4, %v457_v58, %v436_v63  ;;  %p1164_p10 = scmp.lt.s32.totalorder %s1162_s28, %s1156_s29 }
 0x3c7   : > { %v730_v53 = vadd.f32 %v729_v47, %v691_v11  ;;  %v734_v54 = vadd.f32 %v733_v49, %v695_v12 }
 0x3c8   : > { %p1165_p11 = por %p1164_p10, %p1163_p8 }
 0x3c9   : > { %v744_v59 = vadd.f32 %v743_v48, %v734_v54  ;;  %v740_v60 = vadd.f32 %v739_v50, %v730_v53 }
 0x3ca   : > { %p1166_p12 = pnand %p1165_p11, %p1159_p7 }
 0x3cb   : > { %760 = vperm.xlu1 %1116, %v744_v59   ;;  %749 = vperm.xlu0 %1115, %v740_v60   ;;  %746 = vst [vmem:[%s327_s27] sm:$0x1] %v744_v59  ;;  %745 = vst [vmem:[%s321_s20] sm:$0x1] %v740_v60 }
 0x3cc   : > { %1169 = shalt.err (!%p1166_p12)
}
 0x3cd   : > { %s1170_s18 = scalar_lea.hbm %s1667_s19, 16  ;;  %s1174_s9 = scalar_lea.hbm %s1792_s5, 32 }
 0x3ce   : > { %p1171_p13 = scmp.ne.s32.totalorder %s1667_s19, %s1170_s18  ;;  %p1175_p4 = scmp.lt.s32.totalorder %s1667_s19, %s1792_s5 }
 0x3cf   : > { %p1176_p9 = scmp.lt.s32.totalorder %s1174_s9, %s1170_s18 }
 0x3d0   : > { %p1172_p0 = pnand %p1171_p13, %p1417_p2 }
 0x3d1   : > { %p1177_p1 = por %p1176_p9, %p1175_p4 }
 0x3d2   : > { %p1173_p6 = pneg %p1172_p0 }
 0x3d4   : > { %p1178_p3 = pnand %p1177_p1, %p1173_p6 }
 0x3d6   : > { %1181 = shalt.err (!%p1178_p3)
}
 0x3d7   : > { %1031 = dma.vmem_to_hbm [thread:$0]  (%p1417_p2), %s1672_s24, 16, %s1667_s19, %s1685_s11  }
 0x3d8   : > { %s791_s29 = sshll.u32 %s321_s20, 4  ;;  %s333_s12 = scalar_lea.vmem [#allocation12], %s1447_s15  ;;  %s1710_s29 = int_to_ptr.vmem [resolvable:$true] %s791_s29 }
 0x3d9   : > { %459 = vst [vmem:[%s333_s12] sm:$0x1] %v458_v1  ;;  %s1719_s7 = scalar_lea.hbm %s1793_s6, %s1658_s0  ;;  %s770_s27 = scalar_lea.sflag [#allocation6], %s1447_s15 }
 0x3da   : > { %s1182_s9 = scalar_lea.vmem %s1710_s29, 16  ;;  %s1309_s19 = smov [#allocation9]  }
 0x3db   : > { %p1183_p5 = scmp.ne.s32.totalorder %s1710_s29, %s1182_s9  ;;  %s1186_s24 = sshll.u32 %s1309_s19, 4  ;;  %s1187_s24 = int_to_ptr.vmem [resolvable:$false] %s1186_s24 }
 0x3dc   : > { %s1188_s20 = scalar_lea.vmem %s1187_s24, 32  ;;  %p1189_p10 = scmp.lt.s32.totalorder %s1710_s29, %s1187_s24 }
 0x3dd   : > { %p1184_p7 = pnand %p1183_p5, %p1417_p2  ;;  %p1190_p11 = scmp.lt.s32.totalorder %s1188_s20, %s1182_s9 }
 0x3df   : > { %p1185_p8 = pneg %p1184_p7  ;;  %p1191_p12 = por %p1190_p11, %p1189_p10 }
 0x3e1   : > { %p1192_p13 = pnand %p1191_p12, %p1185_p8 }
 0x3e3   : > { %1195 = shalt.err (!%p1192_p13)
}
 0x3e4   : > { %s1196_s0 = scalar_lea.hbm %s1681_s17, 16  ;;  %s1200_s28 = scalar_lea.hbm %s1791_s4, 32 }
 0x3e5   : > { %p1197_p0 = scmp.ne.s32.totalorder %s1681_s17, %s1196_s0  ;;  %p1201_p9 = scmp.lt.s32.totalorder %s1681_s17, %s1791_s4 }
 0x3e6   : > { %p1202_p1 = scmp.lt.s32.totalorder %s1200_s28, %s1196_s0 }
 0x3e7   : > { %p1198_p6 = pnand %p1197_p0, %p1417_p2 }
 0x3e8   : > { %p1203_p3 = por %p1202_p1, %p1201_p9 }
 0x3e9   : > { %p1199_p4 = pneg %p1198_p6 }
 0x3eb   : > { %p1204_p5 = pnand %p1203_p3, %p1199_p4 }
 0x3ed   : > { %1207 = shalt.err (!%p1204_p5)
}
 0x3ee   : > { %1030 = dma.vmem_to_hbm [thread:$0]  (%p1417_p2), %s1710_s29, 16, %s1681_s17, %s770_s27  }
 0x3ef   : > { %s819_s9 = sshll.u32 %s333_s12, 4  ;;  %s1310_s20 = smov [#allocation12]   ;;  %s820_s9 = int_to_ptr.vmem [resolvable:$true] %s819_s9 }
 0x3f0   : > { %s1208_s24 = scalar_lea.vmem %s820_s9, 16  ;;  %s1212_s0 = sshll.u32 %s1310_s20, 4  ;;  %s1213_s0 = int_to_ptr.vmem [resolvable:$false] %s1212_s0 }
 0x3f1   : > { %p1209_p7 = scmp.ne.s32.totalorder %s820_s9, %s1208_s24  ;;  %s1214_s10 = scalar_lea.vmem %s1213_s0, 32 }
 0x3f2   : > { %p1215_p11 = scmp.lt.s32.totalorder %s820_s9, %s1213_s0  ;;  %p1216_p12 = scmp.lt.s32.totalorder %s1214_s10, %s1208_s24 }
 0x3f3   : > { %p1210_p8 = pnand %p1209_p7, %p1417_p2 }
 0x3f4   : > { %p1217_p13 = por %p1216_p12, %p1215_p11 }
 0x3f5   : > { %p1211_p10 = pneg %p1210_p8 }
 0x3f7   : > { %p1218_p0 = pnand %p1217_p13, %p1211_p10 }
 0x3f9   : > { %1221 = shalt.err (!%p1218_p0)
}
 0x3fa   : > { %s1222_s15 = scalar_lea.hbm %s1719_s7, 16  ;;  %s1226_s12 = scalar_lea.hbm %s1793_s6, 32 }
 0x3fb   : > { %p1223_p6 = scmp.ne.s32.totalorder %s1719_s7, %s1222_s15  ;;  %p1227_p1 = scmp.lt.s32.totalorder %s1719_s7, %s1793_s6 }
 0x3fc   : > { %p1228_p3 = scmp.lt.s32.totalorder %s1226_s12, %s1222_s15 }
 0x3fd   : > { %p1224_p4 = pnand %p1223_p6, %p1417_p2 }
 0x3fe   : > { %p1229_p5 = por %p1228_p3, %p1227_p1 }
 0x3ff   : > { %p1225_p9 = pneg %p1224_p4 }
 0x401   : > { %p1230_p7 = pnand %p1229_p5, %p1225_p9 }
 0x403   : > { %1233 = shalt.err (!%p1230_p7)
}
 0x404   : > { %1032 = dma.vmem_to_hbm [thread:$0]  (%p1417_p2), %s820_s9, 16, %s1719_s7, %s1685_s11   ;;  %v753_v0 = vshrl.u32 %v460_v61, 7 }
 0x406   : > { %v754_v2 = vsub.s32 0, %v753_v0 }
 0x446   : > { %v761_v3 = vpop.permute.xlu1 %760  ;;  %v750_v4 = vpop.permute.xlu0 %749 }
 0x447   : > { %v766_v5 = vrot.slane %v761_v3, %v754_v2  ;;  %v755_v6 = vrot.slane %v750_v4, %v754_v2 }
 0x449   : > { %768 = vst [vmem:[#allocation3] sm:$0x1] %v766_v5  ;;  %757 = vst [vmem:[#allocation2] sm:$0x1] %v755_v6 }
 0x44a PF: > { %s831_s28 = sand.u32 1, %s1276_s21   ;;  %p1805_p8 = scmp.ne.s32.totalorder %s1798_s30, 0 }
 0x44b   : > { %p1806_p10 = scmp.ge.s32.totalorder %s1296_s26, 2  ;;  %s832_s13 = scalar_lea.sflag [#allocation6], %s831_s28 }
 0x44d   : > { %p1045_p11 = pnand %p1806_p10, %p1805_p8 }
 0x44f   : > { %p1046_p12 = pneg %p1045_p11 }
 0x451   : > { %1267 = dma.done.wait (%p1046_p12), %s832_s13, 16  }
 0x452   : > { %1269 = vsyncadd (%p1046_p12), %s832_s13, 4294967280  ;;  %s1807_s11 = sadd.s32 4294967294, %s1296_s26  }
 0x453   : > { %s839_s7 = sand.u32 1, %s1807_s11  }
 0x454   : > { %s840_s18 = scalar_lea.sflag [#allocation11], %s839_s7 }
 0x455   : > { %1271 = dma.done.wait (%p1046_p12), %s840_s18, 32  }
 0x456   : > { %1273 = vsyncadd (%p1046_p12), %s840_s18, 4294967264  ;;  %s27_s26 = sadd.s32 1, %s1296_s26   ;;  %s1808_s21 = smov %s1280_s22 }
 0x457   : > { %p24_p2 = scmp.ge.s32.totalorder %s27_s26, 4   ;;  %s1809_s22 = smov %s1284_s23 }
 0x458   : > { %s1810_s23 = smov %s1426_s16  ;;  %s1811_s24 = smov %s1292_s25 }
 0x459   : > { %s1812_s25 = smov %s1814_s8  ;;  %26 = sbr.rel (!%p24_p2) target bundleno = 11 (0xb), region = 128 }
 0x45e   :  { %852 = vsyncpa [#allocation5], 1 }
 0x45f   :  { %854 = vsyncpa [#allocation5 + $0x1], 1 }
 0x460   :  { %855 = vsyncpa [#allocation6], 1 }
 0x461   :  { %857 = vsyncpa [#allocation6 + $0x1], 1 }
 0x462   :  { %858 = vsyncpa [#allocation11], 1 }
 0x463   :  { %860 = vsyncpa [#allocation11 + $0x1], 1 }
 0x464   :  { %861 = vsyncpa [#allocation7], 1 }
 0x465   :  { %863 = vsyncpa [#allocation7 + $0x1], 1 }

</bundles_post_ra>
